<compile_context>
chip_gen: v6e
topology: v6e:2x2x1
jax: 0.10.0
libtpu: 0.0.40
codegen_flags: <defaults>
</compile_context>

<pallas_src>
import functools

import jax
import jax.numpy as jnp
from jax.experimental import pallas as pl
from jax.experimental.pallas import tpu as pltpu


def _has_multiple_tensorcores():
    """True on parts where a batch-parallel grid maps onto >1 TensorCore (v7x, v4/v5p)."""
    try:
        kind = jax.devices()[0].device_kind.lower()
    except Exception:
        return False
    return any(t in kind for t in ("v7", "v4", "v5p"))


def _silu(v):
    # x * sigmoid(x); exp goes to the EUP.
    return v * (1.0 / (1.0 + jnp.exp(-v)))


def unpatch_resnet_kernel(xu_ref, ss_ref, w_ref, v_ref, o_ref, *,
                          num_groups, cm, co, bblk):
    lp = xu_ref.shape[-1]

    # ---- consolidated parameter slabs: static slices (compile-time offsets) ----
    w_slab = w_ref[...]                       # (7*Co, max(Cm,Co))
    w1 = w_slab[0 * co:3 * co, 0:cm]          # Conv1d #1 taps stacked on output rows
    w2 = w_slab[3 * co:6 * co, 0:co]          # Conv1d #2 taps stacked on output rows
    wres = w_slab[6 * co:7 * co, 0:cm]        # 1x1 residual conv

    v_slab = v_ref[...]                       # (2*Cm + 5*Co, 1)
    off = 0
    gn1_g = v_slab[off:off + cm]; off += cm
    gn1_b = v_slab[off:off + cm]; off += cm
    b1 = v_slab[off:off + co]; off += co
    gn2_g = v_slab[off:off + co]; off += co
    gn2_b = v_slab[off:off + co]; off += co
    b2 = v_slab[off:off + co]; off += co
    bres = v_slab[off:off + co]; off += co

    lane = jax.lax.broadcasted_iota(jnp.int32, (1, lp), 1)
    not_first = lane != 0
    not_last = lane != lp - 1

    def group_norm(v, g_col, b_col, eps=1e-5):
        # torch.nn.GroupNorm: stats over (channels-in-group, length), per-channel affine.
        ch = v.shape[0]
        cg = ch // num_groups
        inv_cnt = 1.0 / (cg * lp)
        row = jax.lax.broadcasted_iota(jnp.int32, (ch, 1), 0)
        mu_col = jnp.zeros((ch, 1), jnp.float32)
        rs_col = jnp.zeros((ch, 1), jnp.float32)
        for g in range(num_groups):               # static unroll; slices are compile-time
            vg = v[g * cg:(g + 1) * cg, :]
            mu = jnp.sum(vg, axis=(0, 1), keepdims=True) * inv_cnt
            d = vg - mu
            var = jnp.sum(d * d, axis=(0, 1), keepdims=True) * inv_cnt
            in_g = (row >= g * cg) & (row < (g + 1) * cg)   # merges only touch (C,1) columns
            mu_col = jnp.where(in_g, mu, mu_col)
            rs_col = jnp.where(in_g, jax.lax.rsqrt(var + eps), rs_col)
        return (v - mu_col) * rs_col * g_col + b_col

    def conv3(v, w_all, b_col):
        # Conv1d(kernel=3, padding=1): one fused weight matmul (all 3 taps stacked on the
        # output rows) + two XLU rolls with lane-iota edge zeroing (circular wrap masked).
        u = jnp.dot(w_all, v, preferred_element_type=jnp.float32)          # (3*Co, Lp)
        u_prev = jnp.where(not_first, pltpu.roll(u[0 * co:1 * co, :], 1, axis=1), 0.0)
        u_next = jnp.where(not_last, pltpu.roll(u[2 * co:3 * co, :], lp - 1, axis=1), 0.0)
        return u_prev + u[1 * co:2 * co, :] + u_next + b_col

    for bi in range(bblk):                     # static loop over batch slices in this step
        x = xu_ref[bi]                         # (Cm, Lp): channels on sublanes, length on lanes

        # ---- ConvBlock1d #1: GroupNorm -> SiLU -> Conv1d(k=3) ----
        h = conv3(_silu(group_norm(x, gn1_g, gn1_b)), w1, b1)              # (Co, Lp)

        # ---- MappingToScaleShift (precomputed in wrapper): per-batch (2*Co, 1) column ----
        ss_col = ss_ref[bi]                    # (2*Co, 1)
        scale = ss_col[:co, :]
        shift = ss_col[co:, :]

        # ---- ConvBlock1d #2: GroupNorm -> scale/shift -> SiLU -> Conv1d(k=3) ----
        h2 = group_norm(h, gn2_g, gn2_b) * (scale + 1.0) + shift
        h2 = conv3(_silu(h2), w2, b2)

        # ---- residual: 1x1 conv (to_out) on the unpatched input ----
        res = jnp.dot(wres, x, preferred_element_type=jnp.float32) + bres
        o_ref[bi] = (h2 + res).astype(o_ref.dtype)


def unpatch_block(x, mapping, params, *, patch_size, out_channels, num_groups,
                  multi_tc=None):
    """x: (B, Cin, L) NCL, mapping: (B, F); returns (B, out_channels, L*patch_size)."""
    (gn1_g, gn1_b, w1, b1, gn2_g, gn2_b, w_ss, b_ss, w2, b2, w_res, b_res) = params
    B, cin, L = x.shape
    cm = cin // patch_size
    lp = L * patch_size
    co = out_channels

    if multi_tc is None:
        multi_tc = _has_multiple_tensorcores()
    # Multi-TC: one batch per grid step ("parallel" -> one per core).
    # Single-TC (v5e/v6e): single grid step, batches looped statically in-kernel.
    bblk = 1 if multi_tc else B
    nsteps = B // bblk

    # einops 'b (c p) l -> b c (l p)': pure data movement, one wrapper op (see TODO above).
    xu = x.reshape(B, cm, patch_size, L).transpose(0, 1, 3, 2).reshape(B, cm, lp)

    # MappingToScaleShift precomputed at trace time: tiny (B,F)x(F,2Co) matmul.
    ss = (jax.nn.silu(mapping) @ w_ss.T + b_ss)[:, :, None]               # (B, 2*Co, 1)

    # Consolidated parameter slabs (trace-time layout prep of tiny tensors).
    w1_all = jnp.transpose(w1, (2, 0, 1)).reshape(3 * co, cm)    # taps stacked on output rows
    w2_all = jnp.transpose(w2, (2, 0, 1)).reshape(3 * co, co)
    w_res_m = w_res.reshape(co, cm)                              # 1x1 conv weight
    kw = max(cm, co)
    pad_w = lambda w: jnp.pad(w, ((0, 0), (0, kw - w.shape[1])))
    w_slab = jnp.concatenate([pad_w(w1_all), pad_w(w2_all), pad_w(w_res_m)], axis=0)
    v_slab = jnp.concatenate([gn1_g, gn1_b, b1, gn2_g, gn2_b, b2, b_res]).reshape(-1, 1)

    kernel = functools.partial(unpatch_resnet_kernel,
                               num_groups=num_groups, cm=cm, co=co, bblk=bblk)

    return pl.pallas_call(
        kernel,
        out_shape=jax.ShapeDtypeStruct((B, co, lp), x.dtype),
        grid=(nsteps,),
        in_specs=[
            pl.BlockSpec((bblk, cm, lp), lambda b: (b, 0, 0)),       # xu batch slice(s)
            pl.BlockSpec((bblk, 2 * co, 1), lambda b: (b, 0, 0)),    # scale/shift column(s)
            pl.BlockSpec((7 * co, kw), lambda b: (0, 0)),            # weight slab (const)
            pl.BlockSpec((2 * cm + 5 * co, 1), lambda b: (0, 0)),    # vector slab (const)
        ],
        out_specs=pl.BlockSpec((bblk, co, lp), lambda b: (b, 0, 0)),
        compiler_params=pltpu.CompilerParams(dimension_semantics=("parallel",)),
    )(xu, ss, w_slab, v_slab)


def reference(x, mapping, params, *, patch_size, out_channels, num_groups):
    """Pure-JAX reference mirroring the PyTorch UnpatchBlock forward."""
    (gn1_g, gn1_b, w1, b1, gn2_g, gn2_b, w_ss, b_ss, w2, b2, w_res, b_res) = params
    B, cin, L = x.shape
    cm = cin // patch_size
    co = out_channels
    xu = x.reshape(B, cm, patch_size, L).transpose(0, 1, 3, 2).reshape(B, cm, L * patch_size)

    def gn(v, g, bta, eps=1e-5):
        b_, ch, l = v.shape
        vr = v.reshape(b_, num_groups, ch // num_groups, l)
        mu = vr.mean(axis=(2, 3), keepdims=True)
        var = ((vr - mu) ** 2).mean(axis=(2, 3), keepdims=True)
        vn = ((vr - mu) / jnp.sqrt(var + eps)).reshape(b_, ch, l)
        return vn * g[None, :, None] + bta[None, :, None]

    def silu(v):
        return v * jax.nn.sigmoid(v)

    def conv3(v, w, bias):  # torch Conv1d, kernel=3, padding=1 (cross-correlation)
        l = v.shape[2]
        vp = jnp.pad(v, ((0, 0), (0, 0), (1, 1)))
        out = sum(jnp.einsum('oc,bcl->bol', w[:, :, k], vp[:, :, k:k + l]) for k in range(3))
        return out + bias[None, :, None]

    h = conv3(silu(gn(xu, gn1_g, gn1_b)), w1, b1)
    ss = silu(mapping) @ w_ss.T + b_ss                   # (B, 2*Co)
    scale = ss[:, :co, None]
    shift = ss[:, co:, None]
    h2 = gn(h, gn2_g, gn2_b)
    h2 = h2 * (scale + 1.0) + shift
    h2 = conv3(silu(h2), w2, b2)
    res = jnp.einsum('oc,bcl->bol', w_res[:, :, 0], xu) + b_res[None, :, None]
    return h2 + res


if __name__ == "__main__":
    # UnpatchBlock(in_channels=8, out_channels=16, patch_size=2, context_mapping_features=8)
    B, CIN, L = 2, 8, 16
    P = 2
    CO = 16
    F = 8
    CM = CIN // P
    G = min(P, CO)          # num_groups used by the inner ResnetBlock1d

    key = jax.random.PRNGKey(0)
    ks = jax.random.split(key, 16)
    x = jax.random.normal(ks[0], (B, CIN, L), jnp.float32)       # NCL, like the torch module
    mapping = jax.random.normal(ks[1], (B, F), jnp.float32)

    params = (
        1.0 + 0.2 * jax.random.normal(ks[2], (CM,), jnp.float32),    # GroupNorm #1 weight
        0.1 * jax.random.normal(ks[3], (CM,), jnp.float32),          # GroupNorm #1 bias
        0.25 * jax.random.normal(ks[4], (CO, CM, 3), jnp.float32),   # Conv1d #1 weight (O,I,K)
        0.1 * jax.random.normal(ks[5], (CO,), jnp.float32),          # Conv1d #1 bias
        1.0 + 0.2 * jax.random.normal(ks[6], (CO,), jnp.float32),    # GroupNorm #2 weight
        0.1 * jax.random.normal(ks[7], (CO,), jnp.float32),          # GroupNorm #2 bias
        0.2 * jax.random.normal(ks[8], (2 * CO, F), jnp.float32),    # to_scale_shift Linear W
        0.1 * jax.random.normal(ks[9], (2 * CO,), jnp.float32),      # to_scale_shift Linear b
        0.15 * jax.random.normal(ks[10], (CO, CO, 3), jnp.float32),  # Conv1d #2 weight
        0.1 * jax.random.normal(ks[11], (CO,), jnp.float32),         # Conv1d #2 bias
        0.3 * jax.random.normal(ks[12], (CO, CM, 1), jnp.float32),   # to_out 1x1 conv weight
        0.1 * jax.random.normal(ks[13], (CO,), jnp.float32),         # to_out 1x1 conv bias
    )

    out = unpatch_block(x, mapping, params, patch_size=P, out_channels=CO, num_groups=G)
    out = jax.block_until_ready(out)

    ref = reference(x, mapping, params, patch_size=P, out_channels=CO, num_groups=G)
    assert out.shape == (B, CO, L * P) and out.dtype == x.dtype
    max_err = float(jnp.max(jnp.abs(out - ref)))
    assert jnp.allclose(out, ref, atol=1e-4, rtol=1e-4), f"max abs err {max_err}"

    print("KERNEL_OK")
</pallas_src>

<mosaic_0001>
module attributes {stable_mosaic.version = 11 : i64} {
  func.func @unpatch_resnet_kernel(%arg0: i32, %arg1: memref<2x4x32xf32, #tpu.memory_space<vmem>>, %arg2: memref<2x32x1xf32, #tpu.memory_space<vmem>>, %arg3: memref<112x16xf32, #tpu.memory_space<vmem>>, %arg4: memref<88x1xf32, #tpu.memory_space<vmem>>, %arg5: memref<2x16x32xf32, #tpu.memory_space<vmem>>) attributes {dimension_semantics = [#tpu.dimension_semantics<parallel>], iteration_bounds = array<i64: 1>, scalar_prefetch = 0 : i64, scratch_operands = 0 : i64, tpu.core_type = #tpu.core_type<tc>, window_params = [{transform_indices = @transform_0, window_bounds = array<i64: 2, 4, 32>}, {transform_indices = @transform_1, window_bounds = array<i64: 2, 32, 1>}, {pipeline_mode = #tpu.pipeline_mode<synchronous>, transform_indices = @transform_2, window_bounds = array<i64: 112, 16>}, {pipeline_mode = #tpu.pipeline_mode<synchronous>, transform_indices = @transform_3, window_bounds = array<i64: 88, 1>}, {transform_indices = @transform_4, window_bounds = array<i64: 2, 16, 32>}]} {
    %c0 = arith.constant 0 : index
    %c0_0 = arith.constant 0 : index
    %0 = vector.load %arg3[%c0, %c0_0] : memref<112x16xf32, #tpu.memory_space<vmem>>, vector<112x16xf32>
    %1 = vector.extract_strided_slice %0 {offsets = [0, 0], sizes = [48, 4], strides = [1, 1]} : vector<112x16xf32> to vector<48x4xf32>
    %2 = vector.extract_strided_slice %0 {offsets = [48, 0], sizes = [48, 16], strides = [1, 1]} : vector<112x16xf32> to vector<48x16xf32>
    %3 = vector.extract_strided_slice %0 {offsets = [96, 0], sizes = [16, 4], strides = [1, 1]} : vector<112x16xf32> to vector<16x4xf32>
    %c0_1 = arith.constant 0 : index
    %c0_2 = arith.constant 0 : index
    %4 = vector.load %arg4[%c0_1, %c0_2] : memref<88x1xf32, #tpu.memory_space<vmem>>, vector<88x1xf32>
    %5 = vector.extract_strided_slice %4 {offsets = [0, 0], sizes = [4, 1], strides = [1, 1]} : vector<88x1xf32> to vector<4x1xf32>
    %6 = vector.extract_strided_slice %4 {offsets = [4, 0], sizes = [4, 1], strides = [1, 1]} : vector<88x1xf32> to vector<4x1xf32>
    %7 = vector.extract_strided_slice %4 {offsets = [8, 0], sizes = [16, 1], strides = [1, 1]} : vector<88x1xf32> to vector<16x1xf32>
    %8 = vector.extract_strided_slice %4 {offsets = [24, 0], sizes = [16, 1], strides = [1, 1]} : vector<88x1xf32> to vector<16x1xf32>
    %9 = vector.extract_strided_slice %4 {offsets = [40, 0], sizes = [16, 1], strides = [1, 1]} : vector<88x1xf32> to vector<16x1xf32>
    %10 = vector.extract_strided_slice %4 {offsets = [56, 0], sizes = [16, 1], strides = [1, 1]} : vector<88x1xf32> to vector<16x1xf32>
    %11 = vector.extract_strided_slice %4 {offsets = [72, 0], sizes = [16, 1], strides = [1, 1]} : vector<88x1xf32> to vector<16x1xf32>
    %12 = tpu.iota {dimensions = array<i32: 1>} : vector<1x32xi32>
    %c0_i32 = arith.constant 0 : i32
    %13 = vector.broadcast %c0_i32 : i32 to vector<1x32xi32>
    %14 = arith.cmpi ne, %12, %13 : vector<1x32xi32>
    %c31_i32 = arith.constant 31 : i32
    %15 = vector.broadcast %c31_i32 : i32 to vector<1x32xi32>
    %16 = arith.cmpi ne, %12, %15 : vector<1x32xi32>
    %c0_3 = arith.constant 0 : index
    %c0_4 = arith.constant 0 : index
    %c0_5 = arith.constant 0 : index
    %17 = vector.load %arg1[%c0_3, %c0_4, %c0_5] : memref<2x4x32xf32, #tpu.memory_space<vmem>>, vector<1x4x32xf32>
    %18 = vector.shape_cast %17 : vector<1x4x32xf32> to vector<4x32xf32>
    %19 = tpu.iota {dimensions = array<i32: 0>} : vector<4x1xi32>
    %cst = arith.constant 0.000000e+00 : f32
    %20 = vector.broadcast %cst : f32 to vector<4x1xf32>
    %cst_6 = arith.constant 0.000000e+00 : f32
    %21 = vector.broadcast %cst_6 : f32 to vector<4x1xf32>
    %22 = vector.extract_strided_slice %18 {offsets = [0, 0], sizes = [2, 32], strides = [1, 1]} : vector<4x32xf32> to vector<2x32xf32>
    %23 = vector.shape_cast %22 : vector<2x32xf32> to vector<1x2x32xf32>
    %cst_7 = arith.constant dense<0.000000e+00> : vector<1xf32>
    %24 = vector.multi_reduction <add>, %23, %cst_7 [1, 2] : vector<1x2x32xf32> to vector<1xf32>
    %25 = vector.shape_cast %24 : vector<1xf32> to vector<1x1x1xf32>
    %26 = vector.extract %25[0, 0, 0] : f32 from vector<1x1x1xf32>
    %27 = vector.broadcast %26 : f32 to vector<1x1xf32>
    %cst_8 = arith.constant 1.562500e-02 : f32
    %28 = vector.broadcast %cst_8 : f32 to vector<1x1xf32>
    %29 = arith.mulf %27, %28 : vector<1x1xf32>
    %30 = vector.broadcast %29 : vector<1x1xf32> to vector<2x32xf32>
    %31 = arith.subf %22, %30 : vector<2x32xf32>
    %32 = arith.mulf %31, %31 : vector<2x32xf32>
    %33 = vector.shape_cast %32 : vector<2x32xf32> to vector<1x2x32xf32>
    %cst_9 = arith.constant dense<0.000000e+00> : vector<1xf32>
    %34 = vector.multi_reduction <add>, %33, %cst_9 [1, 2] : vector<1x2x32xf32> to vector<1xf32>
    %35 = vector.shape_cast %34 : vector<1xf32> to vector<1x1x1xf32>
    %36 = vector.extract %35[0, 0, 0] : f32 from vector<1x1x1xf32>
    %37 = vector.broadcast %36 : f32 to vector<1x1xf32>
    %cst_10 = arith.constant 1.562500e-02 : f32
    %38 = vector.broadcast %cst_10 : f32 to vector<1x1xf32>
    %39 = arith.mulf %37, %38 : vector<1x1xf32>
    %c0_i32_11 = arith.constant 0 : i32
    %40 = vector.broadcast %c0_i32_11 : i32 to vector<4x1xi32>
    %41 = arith.cmpi sge, %19, %40 : vector<4x1xi32>
    %c2_i32 = arith.constant 2 : i32
    %42 = vector.broadcast %c2_i32 : i32 to vector<4x1xi32>
    %43 = arith.cmpi slt, %19, %42 : vector<4x1xi32>
    %44 = arith.andi %41, %43 : vector<4x1xi1>
    %45 = vector.shape_cast %29 : vector<1x1xf32> to vector<1x1xf32>
    %46 = vector.broadcast %45 : vector<1x1xf32> to vector<4x1xf32>
    %47 = arith.select %44, %46, %20 : vector<4x1xi1>, vector<4x1xf32>
    %cst_12 = arith.constant 9.99999974E-6 : f32
    %48 = vector.broadcast %cst_12 : f32 to vector<1x1xf32>
    %49 = arith.addf %39, %48 : vector<1x1xf32>
    %50 = math.rsqrt %49 : vector<1x1xf32>
    %51 = vector.shape_cast %50 : vector<1x1xf32> to vector<1x1xf32>
    %52 = vector.broadcast %51 : vector<1x1xf32> to vector<4x1xf32>
    %53 = arith.select %44, %52, %21 : vector<4x1xi1>, vector<4x1xf32>
    %54 = vector.extract_strided_slice %18 {offsets = [2, 0], sizes = [2, 32], strides = [1, 1]} : vector<4x32xf32> to vector<2x32xf32>
    %55 = vector.shape_cast %54 : vector<2x32xf32> to vector<1x2x32xf32>
    %cst_13 = arith.constant dense<0.000000e+00> : vector<1xf32>
    %56 = vector.multi_reduction <add>, %55, %cst_13 [1, 2] : vector<1x2x32xf32> to vector<1xf32>
    %57 = vector.shape_cast %56 : vector<1xf32> to vector<1x1x1xf32>
    %58 = vector.extract %57[0, 0, 0] : f32 from vector<1x1x1xf32>
    %59 = vector.broadcast %58 : f32 to vector<1x1xf32>
    %cst_14 = arith.constant 1.562500e-02 : f32
    %60 = vector.broadcast %cst_14 : f32 to vector<1x1xf32>
    %61 = arith.mulf %59, %60 : vector<1x1xf32>
    %62 = vector.broadcast %61 : vector<1x1xf32> to vector<2x32xf32>
    %63 = arith.subf %54, %62 : vector<2x32xf32>
    %64 = arith.mulf %63, %63 : vector<2x32xf32>
    %65 = vector.shape_cast %64 : vector<2x32xf32> to vector<1x2x32xf32>
    %cst_15 = arith.constant dense<0.000000e+00> : vector<1xf32>
    %66 = vector.multi_reduction <add>, %65, %cst_15 [1, 2] : vector<1x2x32xf32> to vector<1xf32>
    %67 = vector.shape_cast %66 : vector<1xf32> to vector<1x1x1xf32>
    %68 = vector.extract %67[0, 0, 0] : f32 from vector<1x1x1xf32>
    %69 = vector.broadcast %68 : f32 to vector<1x1xf32>
    %cst_16 = arith.constant 1.562500e-02 : f32
    %70 = vector.broadcast %cst_16 : f32 to vector<1x1xf32>
    %71 = arith.mulf %69, %70 : vector<1x1xf32>
    %c2_i32_17 = arith.constant 2 : i32
    %72 = vector.broadcast %c2_i32_17 : i32 to vector<4x1xi32>
    %73 = arith.cmpi sge, %19, %72 : vector<4x1xi32>
    %c4_i32 = arith.constant 4 : i32
    %74 = vector.broadcast %c4_i32 : i32 to vector<4x1xi32>
    %75 = arith.cmpi slt, %19, %74 : vector<4x1xi32>
    %76 = arith.andi %73, %75 : vector<4x1xi1>
    %77 = vector.shape_cast %61 : vector<1x1xf32> to vector<1x1xf32>
    %78 = vector.broadcast %77 : vector<1x1xf32> to vector<4x1xf32>
    %79 = arith.select %76, %78, %47 : vector<4x1xi1>, vector<4x1xf32>
    %cst_18 = arith.constant 9.99999974E-6 : f32
    %80 = vector.broadcast %cst_18 : f32 to vector<1x1xf32>
    %81 = arith.addf %71, %80 : vector<1x1xf32>
    %82 = math.rsqrt %81 : vector<1x1xf32>
    %83 = vector.shape_cast %82 : vector<1x1xf32> to vector<1x1xf32>
    %84 = vector.broadcast %83 : vector<1x1xf32> to vector<4x1xf32>
    %85 = arith.select %76, %84, %53 : vector<4x1xi1>, vector<4x1xf32>
    %86 = vector.broadcast %79 : vector<4x1xf32> to vector<4x32xf32>
    %87 = arith.subf %18, %86 : vector<4x32xf32>
    %88 = vector.broadcast %85 : vector<4x1xf32> to vector<4x32xf32>
    %89 = arith.mulf %87, %88 : vector<4x32xf32>
    %90 = vector.broadcast %5 : vector<4x1xf32> to vector<4x32xf32>
    %91 = arith.mulf %89, %90 : vector<4x32xf32>
    %92 = vector.broadcast %6 : vector<4x1xf32> to vector<4x32xf32>
    %93 = arith.addf %91, %92 : vector<4x32xf32>
    %cst_19 = arith.constant 0.000000e+00 : f32
    %94 = vector.broadcast %cst_19 : f32 to vector<4x32xf32>
    %95 = arith.subf %94, %93 : vector<4x32xf32>
    %96 = math.exp %95 : vector<4x32xf32>
    %cst_20 = arith.constant 1.000000e+00 : f32
    %97 = vector.broadcast %cst_20 : f32 to vector<4x32xf32>
    %98 = arith.addf %97, %96 : vector<4x32xf32>
    %cst_21 = arith.constant 1.000000e+00 : f32
    %99 = vector.broadcast %cst_21 : f32 to vector<4x32xf32>
    %100 = arith.divf %99, %98 : vector<4x32xf32>
    %101 = arith.mulf %93, %100 : vector<4x32xf32>
    %cst_22 = arith.constant dense<0.000000e+00> : vector<48x32xf32>
    %102 = tpu.matmul %1, %101, %cst_22 {dimension_numbers = #tpu.dot_dimension_numbers<[1], [0], [0], [1], [0, 0, 1, 1], [], []>} : vector<48x4xf32>, vector<4x32xf32>, vector<48x32xf32> -> vector<48x32xf32>
    %103 = vector.extract_strided_slice %102 {offsets = [0, 0], sizes = [16, 32], strides = [1, 1]} : vector<48x32xf32> to vector<16x32xf32>
    %c1_i32 = arith.constant 1 : i32
    %104 = tpu.dynamic_rotate %103 by %c1_i32 dim 1 : vector<16x32xf32>, i32 -> vector<16x32xf32>
    %cst_23 = arith.constant 0.000000e+00 : f32
    %105 = vector.shape_cast %14 : vector<1x32xi1> to vector<1x32xi1>
    %106 = vector.broadcast %105 : vector<1x32xi1> to vector<16x32xi1>
    %107 = vector.broadcast %cst_23 : f32 to vector<16x32xf32>
    %108 = arith.select %106, %104, %107 : vector<16x32xi1>, vector<16x32xf32>
    %109 = vector.extract_strided_slice %102 {offsets = [32, 0], sizes = [16, 32], strides = [1, 1]} : vector<48x32xf32> to vector<16x32xf32>
    %c31_i32_24 = arith.constant 31 : i32
    %110 = tpu.dynamic_rotate %109 by %c31_i32_24 dim 1 : vector<16x32xf32>, i32 -> vector<16x32xf32>
    %cst_25 = arith.constant 0.000000e+00 : f32
    %111 = vector.shape_cast %16 : vector<1x32xi1> to vector<1x32xi1>
    %112 = vector.broadcast %111 : vector<1x32xi1> to vector<16x32xi1>
    %113 = vector.broadcast %cst_25 : f32 to vector<16x32xf32>
    %114 = arith.select %112, %110, %113 : vector<16x32xi1>, vector<16x32xf32>
    %115 = vector.extract_strided_slice %102 {offsets = [16, 0], sizes = [16, 32], strides = [1, 1]} : vector<48x32xf32> to vector<16x32xf32>
    %116 = arith.addf %108, %115 : vector<16x32xf32>
    %117 = arith.addf %116, %114 : vector<16x32xf32>
    %118 = vector.broadcast %7 : vector<16x1xf32> to vector<16x32xf32>
    %119 = arith.addf %117, %118 : vector<16x32xf32>
    %c0_26 = arith.constant 0 : index
    %c0_27 = arith.constant 0 : index
    %c0_28 = arith.constant 0 : index
    %120 = vector.load %arg2[%c0_26, %c0_27, %c0_28] : memref<2x32x1xf32, #tpu.memory_space<vmem>>, vector<1x32x1xf32>
    %121 = vector.shape_cast %120 : vector<1x32x1xf32> to vector<32x1xf32>
    %122 = vector.extract_strided_slice %121 {offsets = [0, 0], sizes = [16, 1], strides = [1, 1]} : vector<32x1xf32> to vector<16x1xf32>
    %123 = vector.extract_strided_slice %121 {offsets = [16, 0], sizes = [16, 1], strides = [1, 1]} : vector<32x1xf32> to vector<16x1xf32>
    %124 = tpu.iota {dimensions = array<i32: 0>} : vector<16x1xi32>
    %cst_29 = arith.constant 0.000000e+00 : f32
    %125 = vector.broadcast %cst_29 : f32 to vector<16x1xf32>
    %cst_30 = arith.constant 0.000000e+00 : f32
    %126 = vector.broadcast %cst_30 : f32 to vector<16x1xf32>
    %127 = vector.extract_strided_slice %119 {offsets = [0, 0], sizes = [8, 32], strides = [1, 1]} : vector<16x32xf32> to vector<8x32xf32>
    %128 = vector.shape_cast %127 : vector<8x32xf32> to vector<1x8x32xf32>
    %cst_31 = arith.constant dense<0.000000e+00> : vector<1xf32>
    %129 = vector.multi_reduction <add>, %128, %cst_31 [1, 2] : vector<1x8x32xf32> to vector<1xf32>
    %130 = vector.shape_cast %129 : vector<1xf32> to vector<1x1x1xf32>
    %131 = vector.extract %130[0, 0, 0] : f32 from vector<1x1x1xf32>
    %132 = vector.broadcast %131 : f32 to vector<1x1xf32>
    %cst_32 = arith.constant 3.906250e-03 : f32
    %133 = vector.broadcast %cst_32 : f32 to vector<1x1xf32>
    %134 = arith.mulf %132, %133 : vector<1x1xf32>
    %135 = vector.broadcast %134 : vector<1x1xf32> to vector<8x32xf32>
    %136 = arith.subf %127, %135 : vector<8x32xf32>
    %137 = arith.mulf %136, %136 : vector<8x32xf32>
    %138 = vector.shape_cast %137 : vector<8x32xf32> to vector<1x8x32xf32>
    %cst_33 = arith.constant dense<0.000000e+00> : vector<1xf32>
    %139 = vector.multi_reduction <add>, %138, %cst_33 [1, 2] : vector<1x8x32xf32> to vector<1xf32>
    %140 = vector.shape_cast %139 : vector<1xf32> to vector<1x1x1xf32>
    %141 = vector.extract %140[0, 0, 0] : f32 from vector<1x1x1xf32>
    %142 = vector.broadcast %141 : f32 to vector<1x1xf32>
    %cst_34 = arith.constant 3.906250e-03 : f32
    %143 = vector.broadcast %cst_34 : f32 to vector<1x1xf32>
    %144 = arith.mulf %142, %143 : vector<1x1xf32>
    %c0_i32_35 = arith.constant 0 : i32
    %145 = vector.broadcast %c0_i32_35 : i32 to vector<16x1xi32>
    %146 = arith.cmpi sge, %124, %145 : vector<16x1xi32>
    %c8_i32 = arith.constant 8 : i32
    %147 = vector.broadcast %c8_i32 : i32 to vector<16x1xi32>
    %148 = arith.cmpi slt, %124, %147 : vector<16x1xi32>
    %149 = arith.andi %146, %148 : vector<16x1xi1>
    %150 = vector.shape_cast %134 : vector<1x1xf32> to vector<1x1xf32>
    %151 = vector.broadcast %150 : vector<1x1xf32> to vector<16x1xf32>
    %152 = arith.select %149, %151, %125 : vector<16x1xi1>, vector<16x1xf32>
    %cst_36 = arith.constant 9.99999974E-6 : f32
    %153 = vector.broadcast %cst_36 : f32 to vector<1x1xf32>
    %154 = arith.addf %144, %153 : vector<1x1xf32>
    %155 = math.rsqrt %154 : vector<1x1xf32>
    %156 = vector.shape_cast %155 : vector<1x1xf32> to vector<1x1xf32>
    %157 = vector.broadcast %156 : vector<1x1xf32> to vector<16x1xf32>
    %158 = arith.select %149, %157, %126 : vector<16x1xi1>, vector<16x1xf32>
    %159 = vector.extract_strided_slice %119 {offsets = [8, 0], sizes = [8, 32], strides = [1, 1]} : vector<16x32xf32> to vector<8x32xf32>
    %160 = vector.shape_cast %159 : vector<8x32xf32> to vector<1x8x32xf32>
    %cst_37 = arith.constant dense<0.000000e+00> : vector<1xf32>
    %161 = vector.multi_reduction <add>, %160, %cst_37 [1, 2] : vector<1x8x32xf32> to vector<1xf32>
    %162 = vector.shape_cast %161 : vector<1xf32> to vector<1x1x1xf32>
    %163 = vector.extract %162[0, 0, 0] : f32 from vector<1x1x1xf32>
    %164 = vector.broadcast %163 : f32 to vector<1x1xf32>
    %cst_38 = arith.constant 3.906250e-03 : f32
    %165 = vector.broadcast %cst_38 : f32 to vector<1x1xf32>
    %166 = arith.mulf %164, %165 : vector<1x1xf32>
    %167 = vector.broadcast %166 : vector<1x1xf32> to vector<8x32xf32>
    %168 = arith.subf %159, %167 : vector<8x32xf32>
    %169 = arith.mulf %168, %168 : vector<8x32xf32>
    %170 = vector.shape_cast %169 : vector<8x32xf32> to vector<1x8x32xf32>
    %cst_39 = arith.constant dense<0.000000e+00> : vector<1xf32>
    %171 = vector.multi_reduction <add>, %170, %cst_39 [1, 2] : vector<1x8x32xf32> to vector<1xf32>
    %172 = vector.shape_cast %171 : vector<1xf32> to vector<1x1x1xf32>
    %173 = vector.extract %172[0, 0, 0] : f32 from vector<1x1x1xf32>
    %174 = vector.broadcast %173 : f32 to vector<1x1xf32>
    %cst_40 = arith.constant 3.906250e-03 : f32
    %175 = vector.broadcast %cst_40 : f32 to vector<1x1xf32>
    %176 = arith.mulf %174, %175 : vector<1x1xf32>
    %c8_i32_41 = arith.constant 8 : i32
    %177 = vector.broadcast %c8_i32_41 : i32 to vector<16x1xi32>
    %178 = arith.cmpi sge, %124, %177 : vector<16x1xi32>
    %c16_i32 = arith.constant 16 : i32
    %179 = vector.broadcast %c16_i32 : i32 to vector<16x1xi32>
    %180 = arith.cmpi slt, %124, %179 : vector<16x1xi32>
    %181 = arith.andi %178, %180 : vector<16x1xi1>
    %182 = vector.shape_cast %166 : vector<1x1xf32> to vector<1x1xf32>
    %183 = vector.broadcast %182 : vector<1x1xf32> to vector<16x1xf32>
    %184 = arith.select %181, %183, %152 : vector<16x1xi1>, vector<16x1xf32>
    %cst_42 = arith.constant 9.99999974E-6 : f32
    %185 = vector.broadcast %cst_42 : f32 to vector<1x1xf32>
    %186 = arith.addf %176, %185 : vector<1x1xf32>
    %187 = math.rsqrt %186 : vector<1x1xf32>
    %188 = vector.shape_cast %187 : vector<1x1xf32> to vector<1x1xf32>
    %189 = vector.broadcast %188 : vector<1x1xf32> to vector<16x1xf32>
    %190 = arith.select %181, %189, %158 : vector<16x1xi1>, vector<16x1xf32>
    %191 = vector.broadcast %184 : vector<16x1xf32> to vector<16x32xf32>
    %192 = arith.subf %119, %191 : vector<16x32xf32>
    %193 = vector.broadcast %190 : vector<16x1xf32> to vector<16x32xf32>
    %194 = arith.mulf %192, %193 : vector<16x32xf32>
    %195 = vector.broadcast %8 : vector<16x1xf32> to vector<16x32xf32>
    %196 = arith.mulf %194, %195 : vector<16x32xf32>
    %197 = vector.broadcast %9 : vector<16x1xf32> to vector<16x32xf32>
    %198 = arith.addf %196, %197 : vector<16x32xf32>
    %cst_43 = arith.constant 1.000000e+00 : f32
    %199 = vector.broadcast %cst_43 : f32 to vector<16x1xf32>
    %200 = arith.addf %122, %199 : vector<16x1xf32>
    %201 = vector.broadcast %200 : vector<16x1xf32> to vector<16x32xf32>
    %202 = arith.mulf %198, %201 : vector<16x32xf32>
    %203 = vector.broadcast %123 : vector<16x1xf32> to vector<16x32xf32>
    %204 = arith.addf %202, %203 : vector<16x32xf32>
    %cst_44 = arith.constant 0.000000e+00 : f32
    %205 = vector.broadcast %cst_44 : f32 to vector<16x32xf32>
    %206 = arith.subf %205, %204 : vector<16x32xf32>
    %207 = math.exp %206 : vector<16x32xf32>
    %cst_45 = arith.constant 1.000000e+00 : f32
    %208 = vector.broadcast %cst_45 : f32 to vector<16x32xf32>
    %209 = arith.addf %208, %207 : vector<16x32xf32>
    %cst_46 = arith.constant 1.000000e+00 : f32
    %210 = vector.broadcast %cst_46 : f32 to vector<16x32xf32>
    %211 = arith.divf %210, %209 : vector<16x32xf32>
    %212 = arith.mulf %204, %211 : vector<16x32xf32>
    %cst_47 = arith.constant dense<0.000000e+00> : vector<48x32xf32>
    %213 = tpu.matmul %2, %212, %cst_47 {dimension_numbers = #tpu.dot_dimension_numbers<[1], [0], [0], [1], [0, 0, 1, 1], [], []>} : vector<48x16xf32>, vector<16x32xf32>, vector<48x32xf32> -> vector<48x32xf32>
    %214 = vector.extract_strided_slice %213 {offsets = [0, 0], sizes = [16, 32], strides = [1, 1]} : vector<48x32xf32> to vector<16x32xf32>
    %c1_i32_48 = arith.constant 1 : i32
    %215 = tpu.dynamic_rotate %214 by %c1_i32_48 dim 1 : vector<16x32xf32>, i32 -> vector<16x32xf32>
    %cst_49 = arith.constant 0.000000e+00 : f32
    %216 = vector.shape_cast %14 : vector<1x32xi1> to vector<1x32xi1>
    %217 = vector.broadcast %216 : vector<1x32xi1> to vector<16x32xi1>
    %218 = vector.broadcast %cst_49 : f32 to vector<16x32xf32>
    %219 = arith.select %217, %215, %218 : vector<16x32xi1>, vector<16x32xf32>
    %220 = vector.extract_strided_slice %213 {offsets = [32, 0], sizes = [16, 32], strides = [1, 1]} : vector<48x32xf32> to vector<16x32xf32>
    %c31_i32_50 = arith.constant 31 : i32
    %221 = tpu.dynamic_rotate %220 by %c31_i32_50 dim 1 : vector<16x32xf32>, i32 -> vector<16x32xf32>
    %cst_51 = arith.constant 0.000000e+00 : f32
    %222 = vector.shape_cast %16 : vector<1x32xi1> to vector<1x32xi1>
    %223 = vector.broadcast %222 : vector<1x32xi1> to vector<16x32xi1>
    %224 = vector.broadcast %cst_51 : f32 to vector<16x32xf32>
    %225 = arith.select %223, %221, %224 : vector<16x32xi1>, vector<16x32xf32>
    %226 = vector.extract_strided_slice %213 {offsets = [16, 0], sizes = [16, 32], strides = [1, 1]} : vector<48x32xf32> to vector<16x32xf32>
    %227 = arith.addf %219, %226 : vector<16x32xf32>
    %228 = arith.addf %227, %225 : vector<16x32xf32>
    %229 = vector.broadcast %10 : vector<16x1xf32> to vector<16x32xf32>
    %230 = arith.addf %228, %229 : vector<16x32xf32>
    %cst_52 = arith.constant dense<0.000000e+00> : vector<16x32xf32>
    %231 = tpu.matmul %3, %18, %cst_52 {dimension_numbers = #tpu.dot_dimension_numbers<[1], [0], [0], [1], [0, 0, 1, 1], [], []>} : vector<16x4xf32>, vector<4x32xf32>, vector<16x32xf32> -> vector<16x32xf32>
    %232 = vector.broadcast %11 : vector<16x1xf32> to vector<16x32xf32>
    %233 = arith.addf %231, %232 : vector<16x32xf32>
    %234 = arith.addf %230, %233 : vector<16x32xf32>
    %c0_53 = arith.constant 0 : index
    %c0_54 = arith.constant 0 : index
    %c0_55 = arith.constant 0 : index
    %235 = vector.load %arg5[%c0_53, %c0_54, %c0_55] : memref<2x16x32xf32, #tpu.memory_space<vmem>>, vector<1x16x32xf32>
    %236 = vector.shape_cast %235 : vector<1x16x32xf32> to vector<16x32xf32>
    %237 = vector.shape_cast %234 : vector<16x32xf32> to vector<1x16x32xf32>
    tpu.vector_store %arg5[%c0_53, %c0_54, %c0_55], %237 {strides = array<i32>} : memref<2x16x32xf32, #tpu.memory_space<vmem>>, vector<1x16x32xf32>,
    %c1 = arith.constant 1 : index
    %c0_56 = arith.constant 0 : index
    %c0_57 = arith.constant 0 : index
    %238 = vector.load %arg1[%c1, %c0_56, %c0_57] : memref<2x4x32xf32, #tpu.memory_space<vmem>>, vector<1x4x32xf32>
    %239 = vector.shape_cast %238 : vector<1x4x32xf32> to vector<4x32xf32>
    %240 = tpu.iota {dimensions = array<i32: 0>} : vector<4x1xi32>
    %cst_58 = arith.constant 0.000000e+00 : f32
    %241 = vector.broadcast %cst_58 : f32 to vector<4x1xf32>
    %cst_59 = arith.constant 0.000000e+00 : f32
    %242 = vector.broadcast %cst_59 : f32 to vector<4x1xf32>
    %243 = vector.extract_strided_slice %239 {offsets = [0, 0], sizes = [2, 32], strides = [1, 1]} : vector<4x32xf32> to vector<2x32xf32>
    %244 = vector.shape_cast %243 : vector<2x32xf32> to vector<1x2x32xf32>
    %cst_60 = arith.constant dense<0.000000e+00> : vector<1xf32>
    %245 = vector.multi_reduction <add>, %244, %cst_60 [1, 2] : vector<1x2x32xf32> to vector<1xf32>
    %246 = vector.shape_cast %245 : vector<1xf32> to vector<1x1x1xf32>
    %247 = vector.extract %246[0, 0, 0] : f32 from vector<1x1x1xf32>
    %248 = vector.broadcast %247 : f32 to vector<1x1xf32>
    %cst_61 = arith.constant 1.562500e-02 : f32
    %249 = vector.broadcast %cst_61 : f32 to vector<1x1xf32>
    %250 = arith.mulf %248, %249 : vector<1x1xf32>
    %251 = vector.broadcast %250 : vector<1x1xf32> to vector<2x32xf32>
    %252 = arith.subf %243, %251 : vector<2x32xf32>
    %253 = arith.mulf %252, %252 : vector<2x32xf32>
    %254 = vector.shape_cast %253 : vector<2x32xf32> to vector<1x2x32xf32>
    %cst_62 = arith.constant dense<0.000000e+00> : vector<1xf32>
    %255 = vector.multi_reduction <add>, %254, %cst_62 [1, 2] : vector<1x2x32xf32> to vector<1xf32>
    %256 = vector.shape_cast %255 : vector<1xf32> to vector<1x1x1xf32>
    %257 = vector.extract %256[0, 0, 0] : f32 from vector<1x1x1xf32>
    %258 = vector.broadcast %257 : f32 to vector<1x1xf32>
    %cst_63 = arith.constant 1.562500e-02 : f32
    %259 = vector.broadcast %cst_63 : f32 to vector<1x1xf32>
    %260 = arith.mulf %258, %259 : vector<1x1xf32>
    %c0_i32_64 = arith.constant 0 : i32
    %261 = vector.broadcast %c0_i32_64 : i32 to vector<4x1xi32>
    %262 = arith.cmpi sge, %240, %261 : vector<4x1xi32>
    %c2_i32_65 = arith.constant 2 : i32
    %263 = vector.broadcast %c2_i32_65 : i32 to vector<4x1xi32>
    %264 = arith.cmpi slt, %240, %263 : vector<4x1xi32>
    %265 = arith.andi %262, %264 : vector<4x1xi1>
    %266 = vector.shape_cast %250 : vector<1x1xf32> to vector<1x1xf32>
    %267 = vector.broadcast %266 : vector<1x1xf32> to vector<4x1xf32>
    %268 = arith.select %265, %267, %241 : vector<4x1xi1>, vector<4x1xf32>
    %cst_66 = arith.constant 9.99999974E-6 : f32
    %269 = vector.broadcast %cst_66 : f32 to vector<1x1xf32>
    %270 = arith.addf %260, %269 : vector<1x1xf32>
    %271 = math.rsqrt %270 : vector<1x1xf32>
    %272 = vector.shape_cast %271 : vector<1x1xf32> to vector<1x1xf32>
    %273 = vector.broadcast %272 : vector<1x1xf32> to vector<4x1xf32>
    %274 = arith.select %265, %273, %242 : vector<4x1xi1>, vector<4x1xf32>
    %275 = vector.extract_strided_slice %239 {offsets = [2, 0], sizes = [2, 32], strides = [1, 1]} : vector<4x32xf32> to vector<2x32xf32>
    %276 = vector.shape_cast %275 : vector<2x32xf32> to vector<1x2x32xf32>
    %cst_67 = arith.constant dense<0.000000e+00> : vector<1xf32>
    %277 = vector.multi_reduction <add>, %276, %cst_67 [1, 2] : vector<1x2x32xf32> to vector<1xf32>
    %278 = vector.shape_cast %277 : vector<1xf32> to vector<1x1x1xf32>
    %279 = vector.extract %278[0, 0, 0] : f32 from vector<1x1x1xf32>
    %280 = vector.broadcast %279 : f32 to vector<1x1xf32>
    %cst_68 = arith.constant 1.562500e-02 : f32
    %281 = vector.broadcast %cst_68 : f32 to vector<1x1xf32>
    %282 = arith.mulf %280, %281 : vector<1x1xf32>
    %283 = vector.broadcast %282 : vector<1x1xf32> to vector<2x32xf32>
    %284 = arith.subf %275, %283 : vector<2x32xf32>
    %285 = arith.mulf %284, %284 : vector<2x32xf32>
    %286 = vector.shape_cast %285 : vector<2x32xf32> to vector<1x2x32xf32>
    %cst_69 = arith.constant dense<0.000000e+00> : vector<1xf32>
    %287 = vector.multi_reduction <add>, %286, %cst_69 [1, 2] : vector<1x2x32xf32> to vector<1xf32>
    %288 = vector.shape_cast %287 : vector<1xf32> to vector<1x1x1xf32>
    %289 = vector.extract %288[0, 0, 0] : f32 from vector<1x1x1xf32>
    %290 = vector.broadcast %289 : f32 to vector<1x1xf32>
    %cst_70 = arith.constant 1.562500e-02 : f32
    %291 = vector.broadcast %cst_70 : f32 to vector<1x1xf32>
    %292 = arith.mulf %290, %291 : vector<1x1xf32>
    %c2_i32_71 = arith.constant 2 : i32
    %293 = vector.broadcast %c2_i32_71 : i32 to vector<4x1xi32>
    %294 = arith.cmpi sge, %240, %293 : vector<4x1xi32>
    %c4_i32_72 = arith.constant 4 : i32
    %295 = vector.broadcast %c4_i32_72 : i32 to vector<4x1xi32>
    %296 = arith.cmpi slt, %240, %295 : vector<4x1xi32>
    %297 = arith.andi %294, %296 : vector<4x1xi1>
    %298 = vector.shape_cast %282 : vector<1x1xf32> to vector<1x1xf32>
    %299 = vector.broadcast %298 : vector<1x1xf32> to vector<4x1xf32>
    %300 = arith.select %297, %299, %268 : vector<4x1xi1>, vector<4x1xf32>
    %cst_73 = arith.constant 9.99999974E-6 : f32
    %301 = vector.broadcast %cst_73 : f32 to vector<1x1xf32>
    %302 = arith.addf %292, %301 : vector<1x1xf32>
    %303 = math.rsqrt %302 : vector<1x1xf32>
    %304 = vector.shape_cast %303 : vector<1x1xf32> to vector<1x1xf32>
    %305 = vector.broadcast %304 : vector<1x1xf32> to vector<4x1xf32>
    %306 = arith.select %297, %305, %274 : vector<4x1xi1>, vector<4x1xf32>
    %307 = vector.broadcast %300 : vector<4x1xf32> to vector<4x32xf32>
    %308 = arith.subf %239, %307 : vector<4x32xf32>
    %309 = vector.broadcast %306 : vector<4x1xf32> to vector<4x32xf32>
    %310 = arith.mulf %308, %309 : vector<4x32xf32>
    %311 = vector.broadcast %5 : vector<4x1xf32> to vector<4x32xf32>
    %312 = arith.mulf %310, %311 : vector<4x32xf32>
    %313 = vector.broadcast %6 : vector<4x1xf32> to vector<4x32xf32>
    %314 = arith.addf %312, %313 : vector<4x32xf32>
    %cst_74 = arith.constant 0.000000e+00 : f32
    %315 = vector.broadcast %cst_74 : f32 to vector<4x32xf32>
    %316 = arith.subf %315, %314 : vector<4x32xf32>
    %317 = math.exp %316 : vector<4x32xf32>
    %cst_75 = arith.constant 1.000000e+00 : f32
    %318 = vector.broadcast %cst_75 : f32 to vector<4x32xf32>
    %319 = arith.addf %318, %317 : vector<4x32xf32>
    %cst_76 = arith.constant 1.000000e+00 : f32
    %320 = vector.broadcast %cst_76 : f32 to vector<4x32xf32>
    %321 = arith.divf %320, %319 : vector<4x32xf32>
    %322 = arith.mulf %314, %321 : vector<4x32xf32>
    %cst_77 = arith.constant dense<0.000000e+00> : vector<48x32xf32>
    %323 = tpu.matmul %1, %322, %cst_77 {dimension_numbers = #tpu.dot_dimension_numbers<[1], [0], [0], [1], [0, 0, 1, 1], [], []>} : vector<48x4xf32>, vector<4x32xf32>, vector<48x32xf32> -> vector<48x32xf32>
    %324 = vector.extract_strided_slice %323 {offsets = [0, 0], sizes = [16, 32], strides = [1, 1]} : vector<48x32xf32> to vector<16x32xf32>
    %c1_i32_78 = arith.constant 1 : i32
    %325 = tpu.dynamic_rotate %324 by %c1_i32_78 dim 1 : vector<16x32xf32>, i32 -> vector<16x32xf32>
    %cst_79 = arith.constant 0.000000e+00 : f32
    %326 = vector.shape_cast %14 : vector<1x32xi1> to vector<1x32xi1>
    %327 = vector.broadcast %326 : vector<1x32xi1> to vector<16x32xi1>
    %328 = vector.broadcast %cst_79 : f32 to vector<16x32xf32>
    %329 = arith.select %327, %325, %328 : vector<16x32xi1>, vector<16x32xf32>
    %330 = vector.extract_strided_slice %323 {offsets = [32, 0], sizes = [16, 32], strides = [1, 1]} : vector<48x32xf32> to vector<16x32xf32>
    %c31_i32_80 = arith.constant 31 : i32
    %331 = tpu.dynamic_rotate %330 by %c31_i32_80 dim 1 : vector<16x32xf32>, i32 -> vector<16x32xf32>
    %cst_81 = arith.constant 0.000000e+00 : f32
    %332 = vector.shape_cast %16 : vector<1x32xi1> to vector<1x32xi1>
    %333 = vector.broadcast %332 : vector<1x32xi1> to vector<16x32xi1>
    %334 = vector.broadcast %cst_81 : f32 to vector<16x32xf32>
    %335 = arith.select %333, %331, %334 : vector<16x32xi1>, vector<16x32xf32>
    %336 = vector.extract_strided_slice %323 {offsets = [16, 0], sizes = [16, 32], strides = [1, 1]} : vector<48x32xf32> to vector<16x32xf32>
    %337 = arith.addf %329, %336 : vector<16x32xf32>
    %338 = arith.addf %337, %335 : vector<16x32xf32>
    %339 = vector.broadcast %7 : vector<16x1xf32> to vector<16x32xf32>
    %340 = arith.addf %338, %339 : vector<16x32xf32>
    %c1_82 = arith.constant 1 : index
    %c0_83 = arith.constant 0 : index
    %c0_84 = arith.constant 0 : index
    %341 = vector.load %arg2[%c1_82, %c0_83, %c0_84] : memref<2x32x1xf32, #tpu.memory_space<vmem>>, vector<1x32x1xf32>
    %342 = vector.shape_cast %341 : vector<1x32x1xf32> to vector<32x1xf32>
    %343 = vector.extract_strided_slice %342 {offsets = [0, 0], sizes = [16, 1], strides = [1, 1]} : vector<32x1xf32> to vector<16x1xf32>
    %344 = vector.extract_strided_slice %342 {offsets = [16, 0], sizes = [16, 1], strides = [1, 1]} : vector<32x1xf32> to vector<16x1xf32>
    %345 = tpu.iota {dimensions = array<i32: 0>} : vector<16x1xi32>
    %cst_85 = arith.constant 0.000000e+00 : f32
    %346 = vector.broadcast %cst_85 : f32 to vector<16x1xf32>
    %cst_86 = arith.constant 0.000000e+00 : f32
    %347 = vector.broadcast %cst_86 : f32 to vector<16x1xf32>
    %348 = vector.extract_strided_slice %340 {offsets = [0, 0], sizes = [8, 32], strides = [1, 1]} : vector<16x32xf32> to vector<8x32xf32>
    %349 = vector.shape_cast %348 : vector<8x32xf32> to vector<1x8x32xf32>
    %cst_87 = arith.constant dense<0.000000e+00> : vector<1xf32>
    %350 = vector.multi_reduction <add>, %349, %cst_87 [1, 2] : vector<1x8x32xf32> to vector<1xf32>
    %351 = vector.shape_cast %350 : vector<1xf32> to vector<1x1x1xf32>
    %352 = vector.extract %351[0, 0, 0] : f32 from vector<1x1x1xf32>
    %353 = vector.broadcast %352 : f32 to vector<1x1xf32>
    %cst_88 = arith.constant 3.906250e-03 : f32
    %354 = vector.broadcast %cst_88 : f32 to vector<1x1xf32>
    %355 = arith.mulf %353, %354 : vector<1x1xf32>
    %356 = vector.broadcast %355 : vector<1x1xf32> to vector<8x32xf32>
    %357 = arith.subf %348, %356 : vector<8x32xf32>
    %358 = arith.mulf %357, %357 : vector<8x32xf32>
    %359 = vector.shape_cast %358 : vector<8x32xf32> to vector<1x8x32xf32>
    %cst_89 = arith.constant dense<0.000000e+00> : vector<1xf32>
    %360 = vector.multi_reduction <add>, %359, %cst_89 [1, 2] : vector<1x8x32xf32> to vector<1xf32>
    %361 = vector.shape_cast %360 : vector<1xf32> to vector<1x1x1xf32>
    %362 = vector.extract %361[0, 0, 0] : f32 from vector<1x1x1xf32>
    %363 = vector.broadcast %362 : f32 to vector<1x1xf32>
    %cst_90 = arith.constant 3.906250e-03 : f32
    %364 = vector.broadcast %cst_90 : f32 to vector<1x1xf32>
    %365 = arith.mulf %363, %364 : vector<1x1xf32>
    %c0_i32_91 = arith.constant 0 : i32
    %366 = vector.broadcast %c0_i32_91 : i32 to vector<16x1xi32>
    %367 = arith.cmpi sge, %345, %366 : vector<16x1xi32>
    %c8_i32_92 = arith.constant 8 : i32
    %368 = vector.broadcast %c8_i32_92 : i32 to vector<16x1xi32>
    %369 = arith.cmpi slt, %345, %368 : vector<16x1xi32>
    %370 = arith.andi %367, %369 : vector<16x1xi1>
    %371 = vector.shape_cast %355 : vector<1x1xf32> to vector<1x1xf32>
    %372 = vector.broadcast %371 : vector<1x1xf32> to vector<16x1xf32>
    %373 = arith.select %370, %372, %346 : vector<16x1xi1>, vector<16x1xf32>
    %cst_93 = arith.constant 9.99999974E-6 : f32
    %374 = vector.broadcast %cst_93 : f32 to vector<1x1xf32>
    %375 = arith.addf %365, %374 : vector<1x1xf32>
    %376 = math.rsqrt %375 : vector<1x1xf32>
    %377 = vector.shape_cast %376 : vector<1x1xf32> to vector<1x1xf32>
    %378 = vector.broadcast %377 : vector<1x1xf32> to vector<16x1xf32>
    %379 = arith.select %370, %378, %347 : vector<16x1xi1>, vector<16x1xf32>
    %380 = vector.extract_strided_slice %340 {offsets = [8, 0], sizes = [8, 32], strides = [1, 1]} : vector<16x32xf32> to vector<8x32xf32>
    %381 = vector.shape_cast %380 : vector<8x32xf32> to vector<1x8x32xf32>
    %cst_94 = arith.constant dense<0.000000e+00> : vector<1xf32>
    %382 = vector.multi_reduction <add>, %381, %cst_94 [1, 2] : vector<1x8x32xf32> to vector<1xf32>
    %383 = vector.shape_cast %382 : vector<1xf32> to vector<1x1x1xf32>
    %384 = vector.extract %383[0, 0, 0] : f32 from vector<1x1x1xf32>
    %385 = vector.broadcast %384 : f32 to vector<1x1xf32>
    %cst_95 = arith.constant 3.906250e-03 : f32
    %386 = vector.broadcast %cst_95 : f32 to vector<1x1xf32>
    %387 = arith.mulf %385, %386 : vector<1x1xf32>
    %388 = vector.broadcast %387 : vector<1x1xf32> to vector<8x32xf32>
    %389 = arith.subf %380, %388 : vector<8x32xf32>
    %390 = arith.mulf %389, %389 : vector<8x32xf32>
    %391 = vector.shape_cast %390 : vector<8x32xf32> to vector<1x8x32xf32>
    %cst_96 = arith.constant dense<0.000000e+00> : vector<1xf32>
    %392 = vector.multi_reduction <add>, %391, %cst_96 [1, 2] : vector<1x8x32xf32> to vector<1xf32>
    %393 = vector.shape_cast %392 : vector<1xf32> to vector<1x1x1xf32>
    %394 = vector.extract %393[0, 0, 0] : f32 from vector<1x1x1xf32>
    %395 = vector.broadcast %394 : f32 to vector<1x1xf32>
    %cst_97 = arith.constant 3.906250e-03 : f32
    %396 = vector.broadcast %cst_97 : f32 to vector<1x1xf32>
    %397 = arith.mulf %395, %396 : vector<1x1xf32>
    %c8_i32_98 = arith.constant 8 : i32
    %398 = vector.broadcast %c8_i32_98 : i32 to vector<16x1xi32>
    %399 = arith.cmpi sge, %345, %398 : vector<16x1xi32>
    %c16_i32_99 = arith.constant 16 : i32
    %400 = vector.broadcast %c16_i32_99 : i32 to vector<16x1xi32>
    %401 = arith.cmpi slt, %345, %400 : vector<16x1xi32>
    %402 = arith.andi %399, %401 : vector<16x1xi1>
    %403 = vector.shape_cast %387 : vector<1x1xf32> to vector<1x1xf32>
    %404 = vector.broadcast %403 : vector<1x1xf32> to vector<16x1xf32>
    %405 = arith.select %402, %404, %373 : vector<16x1xi1>, vector<16x1xf32>
    %cst_100 = arith.constant 9.99999974E-6 : f32
    %406 = vector.broadcast %cst_100 : f32 to vector<1x1xf32>
    %407 = arith.addf %397, %406 : vector<1x1xf32>
    %408 = math.rsqrt %407 : vector<1x1xf32>
    %409 = vector.shape_cast %408 : vector<1x1xf32> to vector<1x1xf32>
    %410 = vector.broadcast %409 : vector<1x1xf32> to vector<16x1xf32>
    %411 = arith.select %402, %410, %379 : vector<16x1xi1>, vector<16x1xf32>
    %412 = vector.broadcast %405 : vector<16x1xf32> to vector<16x32xf32>
    %413 = arith.subf %340, %412 : vector<16x32xf32>
    %414 = vector.broadcast %411 : vector<16x1xf32> to vector<16x32xf32>
    %415 = arith.mulf %413, %414 : vector<16x32xf32>
    %416 = vector.broadcast %8 : vector<16x1xf32> to vector<16x32xf32>
    %417 = arith.mulf %415, %416 : vector<16x32xf32>
    %418 = vector.broadcast %9 : vector<16x1xf32> to vector<16x32xf32>
    %419 = arith.addf %417, %418 : vector<16x32xf32>
    %cst_101 = arith.constant 1.000000e+00 : f32
    %420 = vector.broadcast %cst_101 : f32 to vector<16x1xf32>
    %421 = arith.addf %343, %420 : vector<16x1xf32>
    %422 = vector.broadcast %421 : vector<16x1xf32> to vector<16x32xf32>
    %423 = arith.mulf %419, %422 : vector<16x32xf32>
    %424 = vector.broadcast %344 : vector<16x1xf32> to vector<16x32xf32>
    %425 = arith.addf %423, %424 : vector<16x32xf32>
    %cst_102 = arith.constant 0.000000e+00 : f32
    %426 = vector.broadcast %cst_102 : f32 to vector<16x32xf32>
    %427 = arith.subf %426, %425 : vector<16x32xf32>
    %428 = math.exp %427 : vector<16x32xf32>
    %cst_103 = arith.constant 1.000000e+00 : f32
    %429 = vector.broadcast %cst_103 : f32 to vector<16x32xf32>
    %430 = arith.addf %429, %428 : vector<16x32xf32>
    %cst_104 = arith.constant 1.000000e+00 : f32
    %431 = vector.broadcast %cst_104 : f32 to vector<16x32xf32>
    %432 = arith.divf %431, %430 : vector<16x32xf32>
    %433 = arith.mulf %425, %432 : vector<16x32xf32>
    %cst_105 = arith.constant dense<0.000000e+00> : vector<48x32xf32>
    %434 = tpu.matmul %2, %433, %cst_105 {dimension_numbers = #tpu.dot_dimension_numbers<[1], [0], [0], [1], [0, 0, 1, 1], [], []>} : vector<48x16xf32>, vector<16x32xf32>, vector<48x32xf32> -> vector<48x32xf32>
    %435 = vector.extract_strided_slice %434 {offsets = [0, 0], sizes = [16, 32], strides = [1, 1]} : vector<48x32xf32> to vector<16x32xf32>
    %c1_i32_106 = arith.constant 1 : i32
    %436 = tpu.dynamic_rotate %435 by %c1_i32_106 dim 1 : vector<16x32xf32>, i32 -> vector<16x32xf32>
    %cst_107 = arith.constant 0.000000e+00 : f32
    %437 = vector.shape_cast %14 : vector<1x32xi1> to vector<1x32xi1>
    %438 = vector.broadcast %437 : vector<1x32xi1> to vector<16x32xi1>
    %439 = vector.broadcast %cst_107 : f32 to vector<16x32xf32>
    %440 = arith.select %438, %436, %439 : vector<16x32xi1>, vector<16x32xf32>
    %441 = vector.extract_strided_slice %434 {offsets = [32, 0], sizes = [16, 32], strides = [1, 1]} : vector<48x32xf32> to vector<16x32xf32>
    %c31_i32_108 = arith.constant 31 : i32
    %442 = tpu.dynamic_rotate %441 by %c31_i32_108 dim 1 : vector<16x32xf32>, i32 -> vector<16x32xf32>
    %cst_109 = arith.constant 0.000000e+00 : f32
    %443 = vector.shape_cast %16 : vector<1x32xi1> to vector<1x32xi1>
    %444 = vector.broadcast %443 : vector<1x32xi1> to vector<16x32xi1>
    %445 = vector.broadcast %cst_109 : f32 to vector<16x32xf32>
    %446 = arith.select %444, %442, %445 : vector<16x32xi1>, vector<16x32xf32>
    %447 = vector.extract_strided_slice %434 {offsets = [16, 0], sizes = [16, 32], strides = [1, 1]} : vector<48x32xf32> to vector<16x32xf32>
    %448 = arith.addf %440, %447 : vector<16x32xf32>
    %449 = arith.addf %448, %446 : vector<16x32xf32>
    %450 = vector.broadcast %10 : vector<16x1xf32> to vector<16x32xf32>
    %451 = arith.addf %449, %450 : vector<16x32xf32>
    %cst_110 = arith.constant dense<0.000000e+00> : vector<16x32xf32>
    %452 = tpu.matmul %3, %239, %cst_110 {dimension_numbers = #tpu.dot_dimension_numbers<[1], [0], [0], [1], [0, 0, 1, 1], [], []>} : vector<16x4xf32>, vector<4x32xf32>, vector<16x32xf32> -> vector<16x32xf32>
    %453 = vector.broadcast %11 : vector<16x1xf32> to vector<16x32xf32>
    %454 = arith.addf %452, %453 : vector<16x32xf32>
    %455 = arith.addf %451, %454 : vector<16x32xf32>
    %c1_111 = arith.constant 1 : index
    %c0_112 = arith.constant 0 : index
    %c0_113 = arith.constant 0 : index
    %456 = vector.load %arg5[%c1_111, %c0_112, %c0_113] : memref<2x16x32xf32, #tpu.memory_space<vmem>>, vector<1x16x32xf32>
    %457 = vector.shape_cast %456 : vector<1x16x32xf32> to vector<16x32xf32>
    %458 = vector.shape_cast %455 : vector<16x32xf32> to vector<1x16x32xf32>
    tpu.vector_store %arg5[%c1_111, %c0_112, %c0_113], %458 {strides = array<i32>} : memref<2x16x32xf32, #tpu.memory_space<vmem>>, vector<1x16x32xf32>,
    return
  }
  func.func @transform_0(%arg0: i32) -> (i32, i32, i32) {
    %c0_i32 = arith.constant 0 : i32
    %c0_i32_0 = arith.constant 0 : i32
    %c0_i32_1 = arith.constant 0 : i32
    return %arg0, %c0_i32, %c0_i32_0 : i32, i32, i32
  }
  func.func @transform_1(%arg0: i32) -> (i32, i32, i32) {
    %c0_i32 = arith.constant 0 : i32
    %c0_i32_0 = arith.constant 0 : i32
    %c0_i32_1 = arith.constant 0 : i32
    return %arg0, %c0_i32, %c0_i32_0 : i32, i32, i32
  }
  func.func @transform_2(%arg0: i32) -> (i32, i32) {
    %c0_i32 = arith.constant 0 : i32
    %c0_i32_0 = arith.constant 0 : i32
    %c0_i32_1 = arith.constant 0 : i32
    return %c0_i32, %c0_i32_0 : i32, i32
  }
  func.func @transform_3(%arg0: i32) -> (i32, i32) {
    %c0_i32 = arith.constant 0 : i32
    %c0_i32_0 = arith.constant 0 : i32
    %c0_i32_1 = arith.constant 0 : i32
    return %c0_i32, %c0_i32_0 : i32, i32
  }
  func.func @transform_4(%arg0: i32) -> (i32, i32, i32) {
    %c0_i32 = arith.constant 0 : i32
    %c0_i32_0 = arith.constant 0 : i32
    %c0_i32_1 = arith.constant 0 : i32
    return %arg0, %c0_i32, %c0_i32_0 : i32, i32, i32
  }
}

</mosaic_0001>

<bundles_post_ra>
// kernel: tpu_custom_call.1
= control target key start
LH: loop header
LB: loop body
LE: loop exit
PB: predicated region body
PF: predicated region fallthrough
CT: control target
= control target key end

     0   :  { %vm50_vm0 = vcmask 254976   ;;  %s2083_s0 = inlined_call_operand.vmem [shape: f32[2,4,32], index: 0, kind: input, shape index: {}]   ;;  %s2084_s1 = inlined_call_operand.vmem [shape: f32[2,32,1], index: 1, kind: input, shape index: {}]   ;;  %s2085_s2 = inlined_call_operand.vmem [shape: f32[112,16], index: 2, kind: input, shape index: {}]   ;;  %s2086_s3 = inlined_call_operand.vmem [shape: f32[88,1], index: 3, kind: input, shape index: {}]   ;;  %s2087_s4 = inlined_call_operand.hbm [shape: f32[2,16,32], index: 4, kind: output, shape index: {}]  }
   0x1   :  { %v1600_v0 = vld [vmem:[%s2083_s0] sm:$0xf] }
   0x2   :  { %9 = vsyncpa [#allocation3], 0  ;;  %v51_v1 = vsel %vm50_vm0, %v1600_v0, 0.0  ;;  %v85_v2 = vrot.slane %v1600_v0, 2  ;;  %v32_v16 = vld [vmem:[%s2086_s3] sm:$0xff]  ;;  %v1565_v17 = vmov 0   ;;  %v43_v32 = vlaneseq }
   0x3   :  { %52 = vadd.xlane.f32.xlu0 %v51_v1  ;;  %1502 = vset.pattern.permute.xlu1 %v1565_v17  ;;  %v1630_v43 = vld [vmem:[%s2085_s2] sm:$0xff]  ;;  %vm141_vm5 = vcmask 31744   ;;  %vm160_vm6 = vcmask 1043456   ;;  %s1566_s9 = smov 32   ;;  %vm259_vm7 = vcmask 1047808   ;;  %s1567_s12 = smov 97  }
   0x4   :  { %v87_v3 = vsel %vm50_vm0, %v85_v2, 0.0  ;;  %1501 = vset.pattern.permute.xlu0 %v1565_v17  ;;  %v1612_v33 = vshrl.u32 %v43_v32, 7  ;;  %1406 = vmatprep.mubr.msk.f32.mxu0 %vm141_vm5, %v1630_v43  ;;  %s1568_s13 = smov 127   ;;  %vm329_vm10 = vcmask 261120   ;;  %vm473_vm11 = vcmask 130048  }
   0x5   :  { %88 = vadd.xlane.f32.xlu1 %v87_v3 }
   0x6   :  { %vm116_vm1 = vcmp.ge.s32.totalorder %v1612_v33, 2  ;;  %vm117_vm2 = vcmp.lt.s32.totalorder %v1612_v33, 4  ;;  %vm78_vm3 = vcmp.lt.s32.totalorder %v1612_v33, 2 }
   0x7   :  { %vm1617_vm4 = vmand %vm116_vm1, %vm117_vm2 }
  0x8c   :  { %v53_v4 = vpop.xlane.xlu0 %52 }
  0x8d   :  { %v54_v5 = vrot.slane %v53_v4, 4 }
  0x8e   :  { %v89_v18 = vpop.xlane.xlu1 %88 }
  0x8f   :  { %v55_v6 = vadd.f32 %v54_v5, %v53_v4  ;;  %v90_v19 = vrot.slane %v89_v18, 4 }
  0x91   :  { %v56_v7 = vrot.slane %v55_v6, 2  ;;  %v91_v20 = vadd.f32 %v90_v19, %v89_v18 }
  0x93   :  { %v57_v8 = vadd.f32 %v56_v7, %v55_v6  ;;  %v92_v21 = vrot.slane %v91_v20, 2 }
  0x95   :  { %v58_v9 = vrot.slane %v57_v8, 1  ;;  %v93_v25 = vadd.f32 %v92_v21, %v91_v20 }
  0x97   :  { %v59_v10 = vadd.f32 %v58_v9, %v57_v8  ;;  %v94_v28 = vrot.slane %v93_v25, 1 }
  0x99   :  { %1462 = vpush %v59_v10  ;;  %v95_v31 = vadd.f32 %v94_v28, %v93_v25  ;;  %v1648_v10 = vld [vmem:[%s2085_s2 + $0x8] sm:$0xff] }
  0xca   :  { %s1463_s17 = spop %1462 }
  0xcb   :  { %v61_v11 = vstv %s1463_s17 }
  0xcc   :  { %v62_v12 = vmul.f32 0.015625, %v61_v11  ;;  %v1654_v11 = vld [vmem:[%s2085_s2 + $0x10] sm:$0xff] }
  0xce   :  { %v63_v13 = vsub.f32 %v1600_v0, %v62_v12  ;;  %v80_v37 = vsel %vm78_vm3, %v62_v12, 0.0  ;;  %v1666_v12 = vld [vmem:[%s2085_s2 + $0x18] sm:$0xff] }
  0xd0   :  { %v64_v14 = vmul.f32 %v63_v13, %v63_v13  ;;  %v1673_v13 = vld [vmem:[%s2085_s2 + $0x20] sm:$0xff] }
  0xd2   :  { %v65_v15 = vsel %vm50_vm0, %v64_v14, 0.0  ;;  %v1682_v14 = vld [vmem:[%s2085_s2 + $0x28] sm:$0xff] }
  0xd3   :  { %66 = vadd.xlane.f32.xlu0 %v65_v15 }
  0xe9   :  { %127 = vperm.xlu0 %1501, %v32_v16  }
 0x15c   :  { %v67_v22 = vpop.xlane.xlu0 %66 }
 0x15d   :  { %v68_v23 = vrot.slane %v67_v22, 4 }
 0x15f   :  { %v69_v24 = vadd.f32 %v68_v23, %v67_v22 }
 0x161   :  { %v70_v26 = vrot.slane %v69_v24, 2 }
 0x163   :  { %v71_v27 = vadd.f32 %v70_v26, %v69_v24  ;;  %v33_v24 = vld [vmem:[%s2086_s3 + $0x8] sm:$0xff] }
 0x164   :  { %v1634_v58 = vpop.permute.xlu0 %127 }
 0x165   :  { %v72_v29 = vrot.slane %v71_v27, 1  ;;  %v131_v1 = vrot.slane %v1634_v58, 4 }
 0x167   :  { %v73_v30 = vadd.f32 %v72_v29, %v71_v27 }
 0x169   :  { %1464 = vpush %v73_v30  ;;  %v1706_v30 = vand.u32 127, %v43_v32 }
 0x16a   :  { %1466 = vpush %v95_v31 }
 0x16b   :  { %vm45_vm8 = vcmp.ne.s32.totalorder %v1706_v30, 0  ;;  %vm46_vm9 = vcmp.ne.s32.totalorder %v1706_v30, 31 }
 0x19a   :  { %s1465_s20 = spop %1464 }
 0x19b   :  { %s1467_s21 = spop %1466  ;;  %v75_v51 = vstv %s1465_s20 }
 0x19c   :  { %v97_v34 = vstv %s1467_s21  ;;  %v76_v52 = vmul.f32 0.015625, %v75_v51 }
 0x19d   :  { %v98_v36 = vmul.f32 0.015625, %v97_v34 }
 0x19e   :  { %v81_v53 = vadd.f32 1e-05, %v76_v52 }
 0x19f   :  { %v99_v38 = vsub.f32 %v1600_v0, %v98_v36  ;;  %v119_v39 = vsel %vm1617_vm4, %v98_v36, %v80_v37 }
 0x1a0   :  { %1503 = vrsqrt.f32 %v81_v53  ;;  %v123_v60 = vsub.f32 %v1600_v0, %v119_v39 }
 0x1a1   :  { %v100_v40 = vmul.f32 %v99_v38, %v99_v38 }
 0x1a3   :  { %v102_v41 = vrot.slane %v100_v40, 2 }
 0x1a5   :  { %v104_v42 = vsel %vm50_vm0, %v102_v41, 0.0 }
 0x1a6   :  { %105 = vadd.xlane.f32.xlu1 %v104_v42 }
 0x1ad   :  { %v1504_v57 = vpop.eup %1503 }
 0x1ae   :  { %v83_v61 = vsel %vm78_vm3, %v1504_v57, 0.0 }
 0x22f   :  { %v106_v44 = vpop.xlane.xlu1 %105 }
 0x230   :  { %v107_v45 = vrot.slane %v106_v44, 4 }
 0x232   :  { %v108_v46 = vadd.f32 %v107_v45, %v106_v44 }
 0x234   :  { %v109_v47 = vrot.slane %v108_v46, 2 }
 0x236   :  { %v110_v48 = vadd.f32 %v109_v47, %v108_v46 }
 0x238   :  { %v111_v49 = vrot.slane %v110_v48, 1 }
 0x23a   :  { %v112_v50 = vadd.f32 %v111_v49, %v110_v48  ;;  %v34_v48 = vld [vmem:[%s2086_s3 + $0x10] sm:$0xff] }
 0x23c   :  { %1468 = vpush %v112_v50 }
 0x26d   :  { %s1469_s24 = spop %1468 }
 0x26e   :  { %v114_v54 = vstv %s1469_s24 }
 0x26f   :  { %v115_v55 = vmul.f32 0.015625, %v114_v54 }
 0x271   :  { %v120_v56 = vadd.f32 1e-05, %v115_v55 }
 0x273   :  { %1505 = vrsqrt.f32 %v120_v56 }
 0x280   :  { %v1506_v59 = vpop.eup %1505 }
 0x281   :  { %v122_v62 = vsel %vm1617_vm4, %v1506_v59, %v83_v61 }
 0x282   :  { %v124_v63 = vmul.f32 %v123_v60, %v122_v62 }
 0x284   :  { %v130_v2 = vmul.f32 %v1634_v58, %v124_v63 }
 0x286   :  { %v133_v3 = vadd.f32 %v131_v1, %v130_v2 }
 0x288   :  { %v134_v4 = vsub.f32 0.0, %v133_v3 }
 0x28a   :  { %v135_v5 = vmul.f32 1.442695, %v134_v4 }
 0x28c   :  { %1507 = vpow2.f32 %v135_v5 }
 0x299   :  { %v1508_v6 = vpop.eup %1507 }
 0x29a   :  { %v137_v7 = vadd.f32 1.0, %v1508_v6 }
 0x29c   :  { %1509 = vrcp.f32 %v137_v7 }
 0x2a9   :  { %v1510_v8 = vpop.eup %1509 }
 0x2aa   :  { %v140_v9 = vmul.f32 %v1510_v8, %v133_v3 }
 0x2ac   :  { %1404 = vmatprep.subr.msk.mxu0 %vm160_vm6, %v140_v9 }
 0x2ad   :  { %1405 = vmatpush3.msk.msra.mxu0 %vm160_vm6, %v140_v9 }
 0x2ae   :  { %1407 = vmatmul.mubr.msk.f32.vlgmr.msra.gmra.mxu0 %vm141_vm5, %v1648_v10  ;;  %1428 = vmatprep.subr.msk.mxu0 %vm160_vm6, %v1600_v0 }
 0x2af   :  { %1409 = vmatprep.mubr.msk.f32.mxu0 %vm141_vm5, %v1654_v11  ;;  %1429 = vmatpush3.msk.msra.mxu0 %vm160_vm6, %v1600_v0 }
 0x2b2   :  { %1410 = vmatmul.mubr.msk.f32.gmra.mxu0 %vm141_vm5, %v1666_v12 }
 0x2b3   :  { %1412 = vmatprep.mubr.msk.f32.mxu0 %vm141_vm5, %v1673_v13 }
 0x2b6   :  { %1413 = vmatmul.mubr.msk.f32.gmra.mxu0 %vm141_vm5, %v1682_v14 }
 0x36e   :  { %v1408_v0 = vpop.f32.mrf.mxu0 }
 0x370   :  { %v230_v15 = vpop.f32.mrf.mxu0 }
 0x371   :  { %260 = vrot.lane.b32.xlu1 %v230_v15, %s1566_s9 }
 0x372   :  { %v1687_v16 = vpop.f32.mrf.mxu0 }
 0x374   :  { %v240_v17 = vpop.f32.mrf.mxu0 }
 0x376   :  { %v1414_v18 = vpop.f32.mrf.mxu0 }
 0x377   :  { %287 = vrot.lane.b32.xlu0 %v1414_v18, %s1566_s9 }
 0x378   :  { %v250_v19 = vpop.f32.mrf.mxu0 }
 0x379   :  { %284 = vrot.lane.b32.xlu1 %v250_v19, %s1566_s9 }
 0x3e3   :  { %v261_v20 = vpop.permute.xlu1 %260 }
 0x3e4   :  { %v262_v21 = vsel %vm259_vm7, %v261_v20, %v230_v15 }
 0x3e5   :  { %266 = vrot.lane.b32.xlu1 %v262_v21, %s1566_s9 }
 0x3e9   :  { %v288_v42 = vpop.permute.xlu0 %287 }
 0x3ea   :  { %v289_v45 = vsel %vm259_vm7, %v288_v42, %v1414_v18 }
 0x3eb   :  { %v285_v22 = vpop.permute.xlu1 %284 }
 0x3ec   :  { %v286_v23 = vsel %vm259_vm7, %v285_v22, %v250_v19 }
 0x3ed   :  { %290 = vrot.lane.b32.xlu1 %v286_v23, %s1566_s9 }
 0x3f1   :  { %314 = vperm.xlu1 %1502, %v33_v24  }
 0x457   :  { %v267_v25 = vpop.permute.xlu1 %266 }
 0x458   :  { %v270_v26 = vsel %vm259_vm7, %v267_v25, %v230_v15 }
 0x459   :  { %276 = vrot.lane.b32.xlu1 %v270_v26, %s1567_s12 }
 0x45f   :  { %v291_v27 = vpop.permute.xlu1 %290 }
 0x460   :  { %v294_v28 = vsel %vm259_vm7, %v291_v27, %v250_v19 }
 0x461   :  { %300 = vrot.lane.b32.xlu1 %v294_v28, %s1568_s13 }
 0x465   :  { %263 = vrot.lane.b32.xlu1 %v1408_v0, %s1566_s9 }
 0x46c   :  { %v1703_v29 = vpop.permute.xlu1 %314 }
 0x4cb   :  { %v277_v31 = vpop.permute.xlu1 %276 }
 0x4cc   :  { %v282_v34 = vsel %vm45_vm8, %v277_v31, 0.0 }
 0x4cd   :  { %v308_v36 = vadd.f32 %v282_v34, %v240_v17 }
 0x4d3   :  { %v301_v37 = vpop.permute.xlu1 %300 }
 0x4d4   :  { %v306_v38 = vsel %vm46_vm9, %v301_v37, 0.0 }
 0x4d5   :  { %v310_v39 = vadd.f32 %v308_v36, %v306_v38  ;;  %v1750_v38 = vld [vmem:[%s2083_s0 + $0x4] sm:$0xf] }
 0x4d7   :  { %v264_v40 = vpop.permute.xlu1 %263  ;;  %v322_v41 = vadd.f32 %v1703_v29, %v310_v39 }
 0x4d8   :  { %v265_v32 = vsel %vm259_vm7, %v264_v40, %v1408_v0  ;;  %v746_v40 = vsel %vm50_vm0, %v1750_v38, 0.0 }
 0x4d9   :  { %268 = vrot.lane.b32.xlu0 %v265_v32, %s1566_s9  ;;  %v330_v44 = vsel %vm329_vm10, %v322_v41, 0.0 }
 0x4da   :  { %331 = vadd.xlane.f32.xlu1 %v330_v44 }
 0x4dd   :  { %292 = vrot.lane.b32.xlu0 %v289_v45, %s1566_s9 }
 0x54b   :  { %v269_v46 = vpop.permute.xlu0 %268 }
 0x54c   :  { %v271_v47 = vsel %vm259_vm7, %v269_v46, %v1408_v0 }
 0x54d   :  { %278 = vrot.lane.b32.xlu0 %v271_v47, %s1567_s12 }
 0x54f   :  { %v293_v49 = vpop.permute.xlu0 %292 }
 0x550   :  { %v295_v50 = vsel %vm259_vm7, %v293_v49, %v1414_v18 }
 0x551   :  { %319 = vperm.xlu0 %1501, %v34_v48  }
 0x555   :  { %302 = vrot.lane.b32.xlu0 %v295_v50, %s1568_s13 }
 0x563   :  { %v332_v51 = vpop.xlane.xlu1 %331 }
 0x564   :  { %v333_v52 = vrot.slane %v332_v51, 4 }
 0x566   :  { %v334_v53 = vadd.f32 %v333_v52, %v332_v51 }
 0x568   :  { %v335_v54 = vrot.slane %v334_v53, 2 }
 0x56a   :  { %v336_v55 = vadd.f32 %v335_v54, %v334_v53 }
 0x56c   :  { %v337_v56 = vrot.slane %v336_v55, 1 }
 0x56e   :  { %v338_v57 = vadd.f32 %v337_v56, %v336_v55 }
 0x570   :  { %1470 = vpush %v338_v57 }
 0x5a1   :  { %s1471_s16 = spop %1470 }
 0x5a2   :  { %v340_v59 = vstv %s1471_s16 }
 0x5a3   :  { %v341_v60 = vmul.f32 0.00390625, %v340_v59 }
 0x5a5   :  { %v1727_v61 = vsub.f32 %v322_v41, %v341_v60  ;;  %v777_v60 = vrot.slane %v1750_v38, 2 }
 0x5a7   :  { %v343_v62 = vmul.f32 %v1727_v61, %v1727_v61 }
 0x5a9   :  { %v344_v63 = vsel %vm329_vm10, %v343_v62, 0.0 }
 0x5aa   :  { %345 = vadd.xlane.f32.xlu0 %v344_v63  ;;  %v779_v63 = vsel %vm50_vm0, %v777_v60, 0.0 }
 0x5bf   :  { %v279_v2 = vpop.permute.xlu0 %278 }
 0x5c0   :  { %v283_v4 = vsel %vm45_vm8, %v279_v2, 0.0  ;;  %v36_v2 = vld [vmem:[%s2086_s3 + $0x20] sm:$0xff] }
 0x5c1   :  { %v309_v5 = vadd.f32 %v1687_v16, %v283_v4  ;;  %v38_v4 = vld [vmem:[%s2086_s3 + $0x30] sm:$0xff] }
 0x5cc   :  { %v1732_v3 = vpop.permute.xlu0 %319 }
 0x5d0   :  { %v303_v6 = vpop.permute.xlu0 %302 }
 0x5d1   :  { %v307_v7 = vsel %vm46_vm9, %v303_v6, 0.0  ;;  %v324_v6 = vld [vmem:[%s2084_s1] sm:$0xff] }
 0x5d2   :  { %v311_v8 = vadd.f32 %v309_v5, %v307_v7  ;;  %v37_v5 = vld [vmem:[%s2086_s3 + $0x28] sm:$0xff]  ;;  %v433_v7 = vadd.f32 1.0, %v324_v6 }
 0x5d4   :  { %v323_v9 = vadd.f32 %v1732_v3, %v311_v8  ;;  %v326_v8 = vld [vmem:[%s2084_s1 + $0x10] sm:$0xff] }
 0x5d6   :  { %v367_v0 = vsel %vm329_vm10, %v323_v9, 0.0 }
 0x5d7   :  { %368 = vadd.xlane.f32.xlu1 %v367_v0 }
 0x633   :  { %v346_v15 = vpop.xlane.xlu0 %345 }
 0x634   :  { %v347_v17 = vrot.slane %v346_v15, 4 }
 0x636   :  { %v348_v18 = vadd.f32 %v347_v17, %v346_v15 }
 0x638   :  { %v349_v19 = vrot.slane %v348_v18, 2 }
 0x63a   :  { %v350_v20 = vadd.f32 %v349_v19, %v348_v18 }
 0x63c   :  { %v351_v21 = vrot.slane %v350_v20, 1 }
 0x63e   :  { %v352_v22 = vadd.f32 %v351_v21, %v350_v20 }
 0x640   :  { %1472 = vpush %v352_v22 }
 0x660   :  { %v369_v23 = vpop.xlane.xlu1 %368 }
 0x661   :  { %v370_v16 = vrot.slane %v369_v23, 4 }
 0x663   :  { %v371_v24 = vadd.f32 %v370_v16, %v369_v23 }
 0x665   :  { %v372_v25 = vrot.slane %v371_v24, 2 }
 0x667   :  { %v373_v26 = vadd.f32 %v372_v25, %v371_v24 }
 0x669   :  { %v374_v27 = vrot.slane %v373_v26, 1 }
 0x66b   :  { %v375_v28 = vadd.f32 %v374_v27, %v373_v26 }
 0x66d   :  { %1474 = vpush %v375_v28 }
 0x671   :  { %s1741_s17 = spop %1472 }
 0x69e   :  { %s1475_s18 = spop %1474 }
 0x69f   :  { %v377_v31 = vstv %s1475_s18 }
 0x6a0   :  { %v378_v34 = vmul.f32 0.00390625, %v377_v31 }
 0x6a2   :  { %v1743_v36 = vsub.f32 %v323_v9, %v378_v34 }
 0x6a4   :  { %v380_v37 = vmul.f32 %v1743_v36, %v1743_v36 }
 0x6a6   :  { %v381_v39 = vsel %vm329_vm10, %v380_v37, 0.0 }
 0x6a7   :  { %382 = vadd.xlane.f32.xlu1 %v381_v39 }
 0x6ab   :  { %747 = vadd.xlane.f32.xlu1 %v746_v40 }
 0x730   :  { %v383_v41 = vpop.xlane.xlu1 %382 }
 0x731   :  { %v384_v32 = vrot.slane %v383_v41, 4 }
 0x733   :  { %v385_v42 = vadd.f32 %v384_v32, %v383_v41  ;;  %v35_v32 = vld [vmem:[%s2086_s3 + $0x18] sm:$0xff] }
 0x734   :  { %v748_v44 = vpop.xlane.xlu1 %747 }
 0x735   :  { %v386_v45 = vrot.slane %v385_v42, 2  ;;  %v749_v46 = vrot.slane %v748_v44, 4 }
 0x737   :  { %v750_v47 = vadd.f32 %v749_v46, %v748_v44  ;;  %v387_v48 = vadd.f32 %v386_v45, %v385_v42  ;;  %v325_v42 = vld [vmem:[%s2084_s1 + $0x8] sm:$0xff]  ;;  %v327_v45 = vld [vmem:[%s2084_s1 + $0x18] sm:$0xff]  ;;  %v1803_v46 = vld [vmem:[%s2085_s2 + $0x30] sm:$0xff] }
 0x738   :  { %v434_v44 = vadd.f32 1.0, %v325_v42  ;;  %1419 = vmatprep.mubr.msk.f32.mxu1 %vm473_vm11, %v1803_v46 }
 0x739   :  { %v751_v49 = vrot.slane %v750_v47, 2  ;;  %v388_v50 = vrot.slane %v387_v48, 1 }
 0x73b   :  { %v389_v51 = vadd.f32 %v388_v50, %v387_v48  ;;  %v752_v52 = vadd.f32 %v751_v49, %v750_v47  ;;  %v354_v47 = vstv %s1741_s17 }
 0x73c   :  { %v355_v49 = vmul.f32 0.00390625, %v354_v47  ;;  %v1827_v47 = vld [vmem:[%s2085_s2 + $0x38] sm:$0xff] }
 0x73d   :  { %1476 = vpush %v389_v51  ;;  %v753_v53 = vrot.slane %v752_v52, 1 }
 0x73e   :  { %v363_v51 = vadd.f32 1e-05, %v355_v49  ;;  %v1832_v49 = vld [vmem:[%s2085_s2 + $0x40] sm:$0xff] }
 0x73f   :  { %v754_v54 = vadd.f32 %v753_v53, %v752_v52 }
 0x740   :  { %1511 = vrsqrt.f32 %v363_v51 }
 0x741   :  { %1478 = vpush %v754_v54 }
 0x74d   :  { %v1512_v60 = vpop.eup %1511 }
 0x76e   :  { %s1755_s0 = spop %1476 }
 0x76f   :  { %v391_v48 = vstv %s1755_s0 }
 0x770   :  { %v392_v50 = vmul.f32 0.00390625, %v391_v48 }
 0x772   :  { %s1479_s21 = spop %1478  ;;  %v401_v52 = vadd.f32 1e-05, %v392_v50  ;;  %v1841_v50 = vld [vmem:[%s2085_s2 + $0x48] sm:$0xff] }
 0x773   :  { %v756_v55 = vstv %s1479_s21 }
 0x774   :  { %v757_v56 = vmul.f32 0.015625, %v756_v55  ;;  %1513 = vrsqrt.f32 %v401_v52  ;;  %v1846_v52 = vld [vmem:[%s2085_s2 + $0x50] sm:$0xff] }
 0x776   :  { %v758_v57 = vsub.f32 %v1750_v38, %v757_v56  ;;  %v1782_v31 = vsel %vm78_vm3, %v757_v56, 0.0 }
 0x778   :  { %v759_v59 = vmul.f32 %v758_v57, %v758_v57 }
 0x77a   :  { %v760_v62 = vsel %vm50_vm0, %v759_v59, 0.0 }
 0x77b   :  { %761 = vadd.xlane.f32.xlu1 %v760_v62 }
 0x77f   :  { %780 = vadd.xlane.f32.xlu1 %v779_v63 }
 0x781   :  { %v1514_v63 = vpop.eup %1513 }
 0x790   :  { %416 = vperm.xlu1 %1502, %v36_v2   ;;  %v407_v2 = vmul.f32 %v1512_v60, %v1727_v61 }
 0x794   :  { %428 = vperm.xlu1 %1502, %v38_v4  }
 0x798   :  { %423 = vperm.xlu1 %1502, %v37_v5  }
 0x79c   :  { %437 = vperm.xlu1 %1502, %v433_v7   ;;  %v408_v7 = vmul.f32 %v1514_v63, %v1743_v36 }
 0x7a0   :  { %449 = vperm.xlu1 %1502, %v326_v8  }
 0x804   :  { %v762_v9 = vpop.xlane.xlu1 %761 }
 0x805   :  { %v763_v0 = vrot.slane %v762_v9, 4 }
 0x807   :  { %v764_v15 = vadd.f32 %v763_v0, %v762_v9 }
 0x808   :  { %v781_v17 = vpop.xlane.xlu1 %780 }
 0x809   :  { %v765_v18 = vrot.slane %v764_v15, 2  ;;  %v782_v19 = vrot.slane %v781_v17, 4 }
 0x80b   :  { %v783_v20 = vadd.f32 %v782_v19, %v781_v17  ;;  %v766_v21 = vadd.f32 %v765_v18, %v764_v15 }
 0x80c   :  { %v1809_v53 = vpop.permute.xlu1 %416 }
 0x80d   :  { %v784_v22 = vrot.slane %v783_v20, 2  ;;  %v767_v23 = vrot.slane %v766_v21, 1  ;;  %v420_v0 = vmul.f32 %v1809_v53, %v408_v7 }
 0x80f   :  { %v768_v16 = vadd.f32 %v767_v23, %v766_v21  ;;  %v785_v24 = vadd.f32 %v784_v22, %v783_v20 }
 0x810   :  { %v1811_v54 = vpop.permute.xlu1 %428 }
 0x811   :  { %1480 = vpush %v768_v16  ;;  %v786_v25 = vrot.slane %v785_v24, 1  ;;  %v432_v19 = vadd.f32 %v1811_v54, %v420_v0 }
 0x813   :  { %v787_v26 = vadd.f32 %v786_v25, %v785_v24 }
 0x814   :  { %v1813_v57 = vpop.permute.xlu1 %423 }
 0x815   :  { %1482 = vpush %v787_v26 }
 0x818   :  { %v438_v5 = vpop.permute.xlu1 %437 }
 0x81c   :  { %v450_v61 = vpop.permute.xlu1 %449 }
 0x842   :  { %s1776_s6 = spop %1480 }
 0x846   :  { %s1483_s7 = spop %1482 }
 0x847   :  { %v789_v27 = vstv %s1483_s7 }
 0x848   :  { %v1778_v28 = vmul.f32 0.015625, %v789_v27 }
 0x84a   :  { %v791_v34 = vsub.f32 %v1750_v38, %v1778_v28  ;;  %v808_v37 = vsel %vm1617_vm4, %v1778_v28, %v1782_v31 }
 0x84c   :  { %v792_v39 = vmul.f32 %v791_v34, %v791_v34 }
 0x84e   :  { %v794_v40 = vrot.slane %v792_v39, 2 }
 0x850   :  { %v796_v41 = vsel %vm50_vm0, %v794_v40, 0.0 }
 0x851   :  { %797 = vadd.xlane.f32.xlu0 %v796_v41 }
 0x867   :  { %411 = vperm.xlu0 %1501, %v35_v32  }
 0x86b   :  { %442 = vperm.xlu0 %1501, %v434_v44   ;;  %v770_v44 = vstv %s1776_s6 }
 0x86c   :  { %v771_v48 = vmul.f32 0.015625, %v770_v44 }
 0x86e   :  { %v773_v51 = vadd.f32 1e-05, %v771_v48 }
 0x86f   :  { %454 = vperm.xlu0 %1501, %v327_v45  }
 0x8da   :  { %v798_v55 = vpop.xlane.xlu0 %797 }
 0x8db   :  { %v799_v56 = vrot.slane %v798_v55, 4 }
 0x8dd   :  { %v800_v59 = vadd.f32 %v799_v56, %v798_v55 }
 0x8df   :  { %v801_v62 = vrot.slane %v800_v59, 2 }
 0x8e1   :  { %v802_v4 = vadd.f32 %v801_v62, %v800_v59  ;;  %v1855_v59 = vld [vmem:[%s2085_s2 + $0x58] sm:$0xff] }
 0x8e2   :  { %v1816_v6 = vpop.permute.xlu0 %411 }
 0x8e3   :  { %v419_v8 = vmul.f32 %v1816_v6, %v407_v2  ;;  %v803_v9 = vrot.slane %v802_v4, 1 }
 0x8e5   :  { %v431_v15 = vadd.f32 %v1813_v57, %v419_v8  ;;  %v804_v17 = vadd.f32 %v803_v9, %v802_v4  ;;  %v812_v4 = vsub.f32 %v1750_v38, %v808_v37 }
 0x8e6   :  { %v443_v18 = vpop.permute.xlu0 %442 }
 0x8e7   :  { %v445_v20 = vmul.f32 %v438_v5, %v431_v15  ;;  %1484 = vpush %v804_v17  ;;  %v446_v21 = vmul.f32 %v443_v18, %v432_v19 }
 0x8e9   :  { %v457_v22 = vadd.f32 %v450_v61, %v445_v20 }
 0x8ea   :  { %v455_v23 = vpop.permute.xlu0 %454 }
 0x8eb   :  { %v458_v16 = vadd.f32 %v455_v23, %v446_v21  ;;  %v459_v36 = vsub.f32 0.0, %v457_v22 }
 0x8ed   :  { %v460_v24 = vsub.f32 0.0, %v458_v16  ;;  %v461_v25 = vmul.f32 1.442695, %v459_v36 }
 0x8ef   :  { %v463_v26 = vmul.f32 1.442695, %v460_v24  ;;  %1515 = vpow2.f32 %v461_v25 }
 0x8f1   :  { %1517 = vpow2.f32 %v463_v26 }
 0x8fc   :  { %v1516_v27 = vpop.eup %1515 }
 0x8fd   :  { %v465_v34 = vadd.f32 1.0, %v1516_v27 }
 0x8fe   :  { %v1518_v39 = vpop.eup %1517 }
 0x8ff   :  { %v466_v40 = vadd.f32 1.0, %v1518_v39  ;;  %1519 = vrcp.f32 %v465_v34 }
 0x901   :  { %1521 = vrcp.f32 %v466_v40 }
 0x902   :  { %1523 = vrsqrt.f32 %v773_v51 }
 0x90c   :  { %v1520_v41 = vpop.eup %1519 }
 0x90d   :  { %v471_v45 = vmul.f32 %v1520_v41, %v457_v22 }
 0x90e   :  { %v1522_v32 = vpop.eup %1521 }
 0x90f   :  { %v472_v42 = vmul.f32 %v1522_v32, %v458_v16  ;;  %v1524_v62 = vpop.eup %1523 }
 0x910   :  { %v775_v2 = vsel %vm78_vm3, %v1524_v62, 0.0 }
 0x911   :  { %1415 = vmatprep.subr.mxu1 %v472_v42 }
 0x912   :  { %1416 = vmatpush3.msra.mxu1 %v472_v42 }
 0x913   :  { %1417 = vmatprep.subr.mxu1 %v471_v45 }
 0x914   :  { %1418 = vmatpush3.msra.mxu1 %v471_v45 }
 0x915   :  { %1420 = vmatmul.mubr.msk.f32.vlgmr.msra.gmra.mxu1 %vm473_vm11, %v1827_v47 }
 0x916   :  { %1422 = vmatprep.mubr.msk.f32.mxu1 %vm473_vm11, %v1832_v49 }
 0x918   :  { %s1485_s26 = spop %1484 }
 0x919   :  { %v806_v55 = vstv %s1485_s26  ;;  %1423 = vmatmul.mubr.msk.f32.gmra.mxu1 %vm473_vm11, %v1841_v50 }
 0x91a   :  { %v807_v56 = vmul.f32 0.015625, %v806_v55  ;;  %1425 = vmatprep.mubr.msk.f32.mxu1 %vm473_vm11, %v1846_v52 }
 0x91c   :  { %v809_v60 = vadd.f32 1e-05, %v807_v56 }
 0x91d   :  { %1426 = vmatmul.mubr.msk.f32.gmra.mxu1 %vm473_vm11, %v1855_v59 }
 0x91e   :  { %1525 = vrsqrt.f32 %v809_v60  ;;  %1435 = vmatprep.mubr.msk.f32.mxu1 %vm141_vm5, %v1630_v43 }
 0x92b   :  { %v1526_v63 = vpop.eup %1525 }
 0x92c   :  { %v811_v5 = vsel %vm1617_vm4, %v1526_v63, %v775_v2 }
 0x92d   :  { %v813_v7 = vmul.f32 %v812_v4, %v811_v5 }
 0x92f   :  { %v814_v8 = vmul.f32 %v813_v7, %v1634_v58 }
 0x931   :  { %v815_v43 = vadd.f32 %v814_v8, %v131_v1 }
 0x933   :  { %v816_v9 = vsub.f32 0.0, %v815_v43 }
 0x935   :  { %v817_v0 = vmul.f32 1.442695, %v816_v9 }
 0x937   :  { %1527 = vpow2.f32 %v817_v0 }
 0x944   :  { %v1528_v33 = vpop.eup %1527 }
 0x945   :  { %v819_v15 = vadd.f32 1.0, %v1528_v33  ;;  %v1355_v33 = vld [vmem:[%s2084_s1 + $0x20] sm:$0xff] }
 0x947   :  { %1529 = vrcp.f32 %v819_v15  ;;  %v1048_v15 = vadd.f32 1.0, %v1355_v33 }
 0x954   :  { %v1530_v17 = vpop.eup %1529 }
 0x955   :  { %v822_v18 = vmul.f32 %v1530_v17, %v815_v43 }
 0x957   :  { %1433 = vmatprep.subr.msk.mxu1 %vm160_vm6, %v822_v18 }
 0x958   :  { %1434 = vmatpush3.msk.msra.mxu1 %vm160_vm6, %v822_v18 }
 0x959   :  { %1436 = vmatmul.mubr.msk.f32.vlgmr.msra.gmra.mxu1 %vm141_vm5, %v1648_v10  ;;  %1457 = vmatprep.subr.msk.mxu1 %vm160_vm6, %v1750_v38 }
 0x95a   :  { %1438 = vmatprep.mubr.msk.f32.mxu1 %vm141_vm5, %v1654_v11  ;;  %1458 = vmatpush3.msk.msra.mxu1 %vm160_vm6, %v1750_v38 }
 0x95d   :  { %1439 = vmatmul.mubr.msk.f32.gmra.mxu1 %vm141_vm5, %v1666_v12 }
 0x95e   :  { %1441 = vmatprep.mubr.msk.f32.mxu1 %vm141_vm5, %v1673_v13 }
 0x961   :  { %1442 = vmatmul.mubr.msk.f32.gmra.mxu1 %vm141_vm5, %v1682_v14 }
 0x9d5   :  { %v1890_v35 = vpop.f32.mrf.mxu1 }
 0x9d7   :  { %v1892_v58 = vpop.f32.mrf.mxu1 }
 0x9d9   :  { %v1894_v1 = vpop.f32.mrf.mxu1 }
 0x9db   :  { %v1896_v10 = vpop.f32.mrf.mxu1 }
 0x9dd   :  { %v1898_v11 = vpop.f32.mrf.mxu1 }
 0x9df   :  { %v1900_v38 = vpop.f32.mrf.mxu1 }
 0xa19   :  { %v1437_v28 = vpop.f32.mrf.mxu1 }
 0xa1b   :  { %v892_v12 = vpop.f32.mrf.mxu1 }
 0xa1c   :  { %921 = vrot.lane.b32.xlu0 %v892_v12, %s1566_s9 }
 0xa1d   :  { %v1440_v13 = vpop.f32.mrf.mxu1 }
 0xa1f   :  { %v902_v31 = vpop.f32.mrf.mxu1 }
 0xa21   :  { %v1443_v37 = vpop.f32.mrf.mxu1 }
 0xa23   :  { %v912_v14 = vpop.f32.mrf.mxu1 }
 0xa24   :  { %943 = vrot.lane.b32.xlu1 %v912_v14, %s1566_s9 }
 0xa8e   :  { %v922_v19 = vpop.permute.xlu0 %921 }
 0xa8f   :  { %v923_v20 = vsel %vm259_vm7, %v922_v19, %v892_v12 }
 0xa90   :  { %927 = vrot.lane.b32.xlu0 %v923_v20, %s1566_s9 }
 0xa96   :  { %v944_v61 = vpop.permute.xlu1 %943 }
 0xa97   :  { %v945_v21 = vsel %vm259_vm7, %v944_v61, %v912_v14 }
 0xa98   :  { %949 = vrot.lane.b32.xlu1 %v945_v21, %s1566_s9 }
 0xb02   :  { %v928_v22 = vpop.permute.xlu0 %927 }
 0xb03   :  { %v931_v23 = vsel %vm259_vm7, %v928_v22, %v892_v12 }
 0xb04   :  { %935 = vrot.lane.b32.xlu0 %v931_v23, %s1567_s12 }
 0xb08   :  { %924 = vrot.lane.b32.xlu0 %v1437_v28, %s1566_s9 }
 0xb0a   :  { %v950_v16 = vpop.permute.xlu1 %949 }
 0xb0b   :  { %v953_v36 = vsel %vm259_vm7, %v950_v16, %v912_v14 }
 0xb0c   :  { %957 = vrot.lane.b32.xlu1 %v953_v36, %s1568_s13 }
 0xb10   :  { %946 = vrot.lane.b32.xlu1 %v1443_v37, %s1566_s9 }
 0xb76   :  { %v936_v24 = vpop.permute.xlu0 %935 }
 0xb77   :  { %v941_v26 = vsel %vm45_vm8, %v936_v24, 0.0 }
 0xb78   :  { %v965_v34 = vadd.f32 %v941_v26, %v902_v31 }
 0xb7a   :  { %v925_v25 = vpop.permute.xlu0 %924 }
 0xb7b   :  { %v926_v27 = vsel %vm259_vm7, %v925_v25, %v1437_v28 }
 0xb7c   :  { %929 = vrot.lane.b32.xlu1 %v926_v27, %s1566_s9 }
 0xb7e   :  { %v958_v39 = vpop.permute.xlu1 %957 }
 0xb7f   :  { %v963_v40 = vsel %vm46_vm9, %v958_v39, 0.0 }
 0xb80   :  { %v967_v41 = vadd.f32 %v965_v34, %v963_v40 }
 0xb82   :  { %v947_v32 = vpop.permute.xlu1 %946  ;;  %v969_v42 = vadd.f32 %v967_v41, %v1703_v29 }
 0xb83   :  { %v948_v44 = vsel %vm259_vm7, %v947_v32, %v1443_v37 }
 0xb84   :  { %951 = vrot.lane.b32.xlu1 %v948_v44, %s1566_s9  ;;  %v976_v45 = vsel %vm329_vm10, %v969_v42, 0.0  ;;  %v1356_v44 = vld [vmem:[%s2084_s1 + $0x28] sm:$0xff] }
 0xb85   :  { %977 = vadd.xlane.f32.xlu0 %v976_v45  ;;  %v1049_v45 = vadd.f32 1.0, %v1356_v44 }
 0xbee   :  { %v930_v48 = vpop.permute.xlu1 %929 }
 0xbef   :  { %v932_v51 = vsel %vm259_vm7, %v930_v48, %v1437_v28  ;;  %v1358_v48 = vld [vmem:[%s2084_s1 + $0x38] sm:$0xff] }
 0xbf0   :  { %937 = vrot.lane.b32.xlu1 %v932_v51, %s1567_s12  ;;  %v1357_v51 = vld [vmem:[%s2084_s1 + $0x30] sm:$0xff] }
 0xbf6   :  { %v952_v55 = vpop.permute.xlu1 %951 }
 0xbf7   :  { %v954_v56 = vsel %vm259_vm7, %v952_v55, %v1443_v37  ;;  %v30_v55 = vld [vmem:[%s2085_s2 + $0x60] sm:$0xff] }
 0xbf8   :  { %959 = vrot.lane.b32.xlu1 %v954_v56, %s1568_s13  ;;  %v31_v56 = vld [vmem:[%s2085_s2 + $0x68] sm:$0xff]  ;;  %1430 = vmatprep.mubr.msk.f32.mxu0 %vm141_vm5, %v30_v55 }
 0xbf9   :  { %1459 = vmatprep.mubr.msk.f32.mxu1 %vm141_vm5, %v30_v55  ;;  %1431 = vmatmul.mubr.msk.f32.vlgmr.msra.gmra.mxu0 %vm141_vm5, %v31_v56 }
 0xbfa   :  { %1460 = vmatmul.mubr.msk.f32.vlgmr.msra.gmra.mxu1 %vm141_vm5, %v31_v56  ;;  %1448 = vmatprep.mubr.msk.f32.mxu0 %vm473_vm11, %v1803_v46 }
 0xc0e   :  { %v978_v60 = vpop.xlane.xlu0 %977 }
 0xc0f   :  { %v979_v62 = vrot.slane %v978_v60, 4 }
 0xc11   :  { %v980_v29 = vadd.f32 %v979_v62, %v978_v60 }
 0xc13   :  { %v981_v63 = vrot.slane %v980_v29, 2 }
 0xc15   :  { %v982_v2 = vadd.f32 %v981_v63, %v980_v29 }
 0xc17   :  { %v983_v4 = vrot.slane %v982_v2, 1 }
 0xc19   :  { %v984_v5 = vadd.f32 %v983_v4, %v982_v2 }
 0xc1b   :  { %1486 = vpush %v984_v5 }
 0xc4c   :  { %s1487_s29 = spop %1486 }
 0xc4d   :  { %v986_v7 = vstv %s1487_s29 }
 0xc4e   :  { %v987_v8 = vmul.f32 0.00390625, %v986_v7 }
 0xc50   :  { %v1928_v43 = vsub.f32 %v969_v42, %v987_v8 }
 0xc52   :  { %v989_v9 = vmul.f32 %v1928_v43, %v1928_v43 }
 0xc54   :  { %v990_v0 = vsel %vm329_vm10, %v989_v9, 0.0 }
 0xc55   :  { %991 = vadd.xlane.f32.xlu1 %v990_v0 }
 0xc62   :  { %v938_v17 = vpop.permute.xlu1 %937 }
 0xc63   :  { %v942_v18 = vsel %vm45_vm8, %v938_v17, 0.0 }
 0xc64   :  { %v966_v28 = vadd.f32 %v1440_v13, %v942_v18 }
 0xc66   :  { %1052 = vperm.xlu1 %1502, %v1048_v15  }
 0xc6a   :  { %590 = vrot.lane.b32.xlu1 %v1890_v35, %s1566_s9  ;;  %v960_v12 = vpop.permute.xlu1 %959 }
 0xc6b   :  { %v964_v31 = vsel %vm46_vm9, %v960_v12, 0.0 }
 0xc6c   :  { %v968_v37 = vadd.f32 %v966_v28, %v964_v31 }
 0xc6e   :  { %612 = vrot.lane.b32.xlu1 %v1898_v11, %s1566_s9  ;;  %v970_v14 = vadd.f32 %v968_v37, %v1732_v3 }
 0xc70   :  { %v1008_v19 = vsel %vm329_vm10, %v970_v14, 0.0 }
 0xc71   :  { %1009 = vadd.xlane.f32.xlu0 %v1008_v19 }
 0xcde   :  { %v992_v20 = vpop.xlane.xlu1 %991 }
 0xcdf   :  { %v993_v61 = vrot.slane %v992_v20, 4 }
 0xce1   :  { %v994_v21 = vadd.f32 %v993_v61, %v992_v20 }
 0xce2   :  { %v1053_v37 = vpop.permute.xlu1 %1052 }
 0xce3   :  { %v995_v13 = vrot.slane %v994_v21, 2 }
 0xce5   :  { %v996_v22 = vadd.f32 %v995_v13, %v994_v21 }
 0xce7   :  { %v997_v23 = vrot.slane %v996_v22, 1 }
 0xce9   :  { %v998_v16 = vadd.f32 %v997_v23, %v996_v22 }
 0xceb   :  { %1488 = vpush %v998_v16 }
 0xcfa   :  { %v1010_v36 = vpop.xlane.xlu0 %1009 }
 0xcfb   :  { %v1011_v24 = vrot.slane %v1010_v36, 4 }
 0xcfd   :  { %v1012_v25 = vadd.f32 %v1011_v24, %v1010_v36 }
 0xcff   :  { %v1013_v26 = vrot.slane %v1012_v25, 2 }
 0xd01   :  { %v1014_v27 = vadd.f32 %v1013_v26, %v1012_v25 }
 0xd03   :  { %v1015_v34 = vrot.slane %v1014_v27, 1 }
 0xd05   :  { %v1016_v39 = vadd.f32 %v1015_v34, %v1014_v27 }
 0xd07   :  { %1490 = vpush %v1016_v39 }
 0xd1c   :  { %s1946_s6 = spop %1488 }
 0xd1d   :  { %v1000_v7 = vstv %s1946_s6 }
 0xd1e   :  { %v1001_v8 = vmul.f32 0.00390625, %v1000_v7 }
 0xd20   :  { %v1004_v9 = vadd.f32 1e-05, %v1001_v8 }
 0xd22   :  { %1531 = vrsqrt.f32 %v1004_v9 }
 0xd2f   :  { %v1532_v0 = vpop.eup %1531 }
 0xd30   :  { %v1042_v18 = vmul.f32 %v1532_v0, %v1928_v43 }
 0xd32   :  { %v1044_v28 = vmul.f32 %v1042_v18, %v1816_v6 }
 0xd34   :  { %v1046_v31 = vadd.f32 %v1044_v28, %v1813_v57 }
 0xd36   :  { %v1060_v19 = vmul.f32 %v1053_v37, %v1046_v31 }
 0xd38   :  { %s1491_s7 = spop %1490 }
 0xd39   :  { %v1018_v3 = vstv %s1491_s7 }
 0xd3a   :  { %v1019_v40 = vmul.f32 0.00390625, %v1018_v3 }
 0xd3c   :  { %v1020_v41 = vsub.f32 %v970_v14, %v1019_v40 }
 0xd3e   :  { %v1021_v32 = vmul.f32 %v1020_v41, %v1020_v41 }
 0xd40   :  { %v1022_v42 = vsel %vm329_vm10, %v1021_v32, 0.0 }
 0xd41   :  { %1023 = vadd.xlane.f32.xlu0 %v1022_v42 }
 0xd57   :  { %1057 = vperm.xlu0 %1501, %v1049_v45  }
 0xd5b   :  { %1069 = vperm.xlu0 %1501, %v1358_v48  }
 0xd5f   :  { %1064 = vperm.xlu0 %1501, %v1357_v51  }
 0xd63   :  { %587 = vrot.lane.b32.xlu0 %v1892_v58, %s1566_s9 }
 0xd67   :  { %609 = vrot.lane.b32.xlu0 %v1900_v38, %s1566_s9 }
 0xdca   :  { %v1024_v60 = vpop.xlane.xlu0 %1023 }
 0xdcb   :  { %v1025_v62 = vrot.slane %v1024_v60, 4 }
 0xdcd   :  { %v1026_v29 = vadd.f32 %v1025_v62, %v1024_v60 }
 0xdcf   :  { %v1027_v63 = vrot.slane %v1026_v29, 2 }
 0xdd1   :  { %v1028_v2 = vadd.f32 %v1027_v63, %v1026_v29 }
 0xdd2   :  { %v1058_v15 = vpop.permute.xlu0 %1057 }
 0xdd3   :  { %v1029_v4 = vrot.slane %v1028_v2, 1 }
 0xdd5   :  { %v1030_v5 = vadd.f32 %v1029_v4, %v1028_v2 }
 0xdd6   :  { %v1070_v12 = vpop.permute.xlu0 %1069 }
 0xdd7   :  { %1492 = vpush %v1030_v5 }
 0xdda   :  { %v1065_v14 = vpop.permute.xlu0 %1064 }
 0xddb   :  { %v1072_v20 = vadd.f32 %v1065_v14, %v1060_v19 }
 0xddd   :  { %v1074_v13 = vsub.f32 0.0, %v1072_v20 }
 0xddf   :  { %v1076_v16 = vmul.f32 1.442695, %v1074_v13 }
 0xe08   :  { %s1493_s1 = spop %1492 }
 0xe09   :  { %v1032_v33 = vstv %s1493_s1 }
 0xe0a   :  { %v1033_v17 = vmul.f32 0.00390625, %v1032_v33 }
 0xe0c   :  { %v1036_v46 = vadd.f32 1e-05, %v1033_v17  ;;  %v39_v17 = vld [vmem:[%s2086_s3 + $0x38] sm:$0xff] }
 0xe0e   :  { %1533 = vrsqrt.f32 %v1036_v46 }
 0xe0f   :  { %1535 = vpow2.f32 %v1076_v16 }
 0xe1b   :  { %v1534_v61 = vpop.eup %1533 }
 0xe1c   :  { %v1043_v21 = vmul.f32 %v1534_v61, %v1020_v41  ;;  %v1536_v25 = vpop.eup %1535 }
 0xe1d   :  { %v1080_v57 = vadd.f32 1.0, %v1536_v25 }
 0xe1e   :  { %v1045_v22 = vmul.f32 %v1043_v21, %v1809_v53  ;;  %v1990_v53 = vpop.f32.mrf.mxu0 }
 0xe20   :  { %v1047_v23 = vadd.f32 %v1045_v22, %v1811_v54  ;;  %v1992_v54 = vpop.f32.mrf.mxu0 }
 0xe22   :  { %v1061_v43 = vmul.f32 %v1058_v15, %v1047_v23  ;;  %v40_v15 = vld [vmem:[%s2086_s3 + $0x40] sm:$0xff] }
 0xe24   :  { %v1073_v36 = vadd.f32 %v1070_v12, %v1061_v43 }
 0xe26   :  { %v1075_v24 = vsub.f32 0.0, %v1073_v36 }
 0xe28   :  { %v1078_v6 = vmul.f32 1.442695, %v1075_v24 }
 0xe2a   :  { %1537 = vpow2.f32 %v1078_v6 }
 0xe2b   :  { %1539 = vrcp.f32 %v1080_v57 }
 0xe37   :  { %v1538_v26 = vpop.eup %1537 }
 0xe38   :  { %v1081_v27 = vadd.f32 1.0, %v1538_v26  ;;  %v1540_v34 = vpop.eup %1539 }
 0xe39   :  { %v1086_v40 = vmul.f32 %v1540_v34, %v1072_v20 }
 0xe3a   :  { %1541 = vrcp.f32 %v1081_v27 }
 0xe47   :  { %v1542_v39 = vpop.eup %1541 }
 0xe48   :  { %v1087_v3 = vmul.f32 %v1542_v39, %v1073_v36 }
 0xe4a   :  { %1444 = vmatprep.subr.mxu0 %v1087_v3 }
 0xe4b   :  { %1445 = vmatpush3.msra.mxu0 %v1087_v3 }
 0xe4c   :  { %1446 = vmatprep.subr.mxu0 %v1086_v40 }
 0xe4d   :  { %1447 = vmatpush3.msra.mxu0 %v1086_v40 }
 0xe4e   :  { %1449 = vmatmul.mubr.msk.f32.vlgmr.msra.gmra.mxu0 %vm473_vm11, %v1827_v47 }
 0xe4f   :  { %1451 = vmatprep.mubr.msk.f32.mxu0 %vm473_vm11, %v1832_v49 }
 0xe52   :  { %1452 = vmatmul.mubr.msk.f32.gmra.mxu0 %vm473_vm11, %v1841_v50  ;;  %v591_v50 = vpop.permute.xlu1 %590 }
 0xe53   :  { %1454 = vmatprep.mubr.msk.f32.mxu0 %vm473_vm11, %v1846_v52  ;;  %v588_v52 = vpop.permute.xlu0 %587  ;;  %v592_v44 = vsel %vm259_vm7, %v591_v50, %v1890_v35 }
 0xe54   :  { %v589_v48 = vsel %vm259_vm7, %v588_v52, %v1892_v58 }
 0xe56   :  { %1455 = vmatmul.mubr.msk.f32.gmra.mxu0 %vm473_vm11, %v1855_v59  ;;  %v613_v45 = vpop.permute.xlu1 %612 }
 0xe57   :  { %v610_v51 = vpop.permute.xlu0 %609  ;;  %v614_v55 = vsel %vm259_vm7, %v613_v45, %v1898_v11 }
 0xe58   :  { %v611_v56 = vsel %vm259_vm7, %v610_v51, %v1900_v38 }
 0xf0e   :  { %v1450_v41 = vpop.f32.mrf.mxu0 }
 0xf0f   :  { %1186 = vrot.lane.b32.xlu1 %v1450_v41, %s1566_s9 }
 0xf10   :  { %v1154_v47 = vpop.f32.mrf.mxu0 }
 0xf11   :  { %1183 = vrot.lane.b32.xlu0 %v1154_v47, %s1566_s9 }
 0xf12   :  { %v1996_v49 = vpop.f32.mrf.mxu0 }
 0xf14   :  { %v1998_v32 = vpop.f32.mrf.mxu0 }
 0xf16   :  { %v1456_v42 = vpop.f32.mrf.mxu0 }
 0xf17   :  { %1208 = vrot.lane.b32.xlu1 %v1456_v42, %s1566_s9 }
 0xf18   :  { %v1174_v59 = vpop.f32.mrf.mxu0 }
 0xf19   :  { %1205 = vrot.lane.b32.xlu0 %v1174_v59, %s1566_s9 }
 0xf1b   :  { %595 = vrot.lane.b32.xlu1 %v592_v44, %s1566_s9  ;;  %v1461_v44 = vpop.f32.mrf.mxu1 }
 0xf1d   :  { %593 = vrot.lane.b32.xlu0 %v589_v48, %s1566_s9 }
 0xf1f   :  { %617 = vrot.lane.b32.xlu1 %v614_v55, %s1566_s9 }
 0xf21   :  { %615 = vrot.lane.b32.xlu0 %v611_v56, %s1566_s9 }
 0xf81   :  { %v1187_v60 = vpop.permute.xlu1 %1186 }
 0xf82   :  { %v1188_v62 = vsel %vm259_vm7, %v1187_v60, %v1450_v41  ;;  %v1301_v60 = vpop.f32.mrf.mxu1 }
 0xf83   :  { %v1184_v29 = vpop.permute.xlu0 %1183  ;;  %1191 = vrot.lane.b32.xlu1 %v1188_v62, %s1566_s9 }
 0xf84   :  { %v1185_v63 = vsel %vm259_vm7, %v1184_v29, %v1154_v47 }
 0xf85   :  { %1189 = vrot.lane.b32.xlu0 %v1185_v63, %s1566_s9 }
 0xf89   :  { %v1209_v2 = vpop.permute.xlu1 %1208 }
 0xf8a   :  { %v1210_v4 = vsel %vm259_vm7, %v1209_v2, %v1456_v42 }
 0xf8b   :  { %1213 = vrot.lane.b32.xlu1 %v1210_v4, %s1566_s9  ;;  %v1206_v5 = vpop.permute.xlu0 %1205 }
 0xf8c   :  { %v1207_v7 = vsel %vm259_vm7, %v1206_v5, %v1174_v59 }
 0xf8d   :  { %v596_v8 = vpop.permute.xlu1 %595  ;;  %1211 = vrot.lane.b32.xlu0 %v1207_v7, %s1566_s9 }
 0xf8e   :  { %v598_v9 = vsel %vm259_vm7, %v596_v8, %v1890_v35  ;;  %v42_v35 = vld [vmem:[%s2086_s3 + $0x50] sm:$0xff] }
 0xf8f   :  { %603 = vrot.lane.b32.xlu1 %v598_v9, %s1567_s12  ;;  %v594_v0 = vpop.permute.xlu0 %593 }
 0xf90   :  { %v597_v33 = vsel %vm259_vm7, %v594_v0, %v1892_v58  ;;  %v41_v58 = vld [vmem:[%s2086_s3 + $0x48] sm:$0xff]  ;;  %s1569_s3 = smov [#allocation2]  }
 0xf91   :  { %601 = vrot.lane.b32.xlu0 %v597_v33, %s1567_s12  ;;  %v618_v18 = vpop.permute.xlu1 %617 }
 0xf92   :  { %v620_v28 = vsel %vm259_vm7, %v618_v18, %v1898_v11 }
 0xf93   :  { %642 = vperm.xlu1 %1502, %v40_v15   ;;  %v616_v46 = vpop.permute.xlu0 %615 }
 0xf94   :  { %v619_v12 = vsel %vm259_vm7, %v616_v46, %v1900_v38 }
 0xf95   :  { %637 = vperm.xlu0 %1501, %v39_v17  }
 0xf97   :  { %654 = vperm.xlu1 %1502, %v42_v35  }
 0xf99   :  { %649 = vperm.xlu0 %1501, %v41_v58  }
 0xf9b   :  { %625 = vrot.lane.b32.xlu1 %v620_v28, %s1568_s13 }
 0xf9d   :  { %623 = vrot.lane.b32.xlu0 %v619_v12, %s1568_s13 }
 0xff5   :  { %v1192_v31 = vpop.permute.xlu1 %1191 }
 0xff6   :  { %v1194_v37 = vsel %vm259_vm7, %v1192_v31, %v1450_v41 }
 0xff7   :  { %1199 = vrot.lane.b32.xlu1 %v1194_v37, %s1567_s12  ;;  %v1190_v14 = vpop.permute.xlu0 %1189 }
 0xff8   :  { %v1193_v19 = vsel %vm259_vm7, %v1190_v14, %v1154_v47 }
 0xff9   :  { %1197 = vrot.lane.b32.xlu0 %v1193_v19, %s1567_s12  ;;  %s1320_s12 = sshll.u32 %s1569_s3, 4  ;;  %s1321_s12 = int_to_ptr.vmem [resolvable:$true] %s1320_s12 }
 0xffa   :  { %p1548_p1 = scmp.lt.s32.totalorder %s1321_s12, %s1321_s12 }
 0xffd   :  { %v1214_v20 = vpop.permute.xlu1 %1213 }
 0xffe   :  { %v1216_v11 = vsel %vm259_vm7, %v1214_v20, %v1456_v42 }
 0xfff   :  { %1221 = vrot.lane.b32.xlu1 %v1216_v11, %s1568_s13  ;;  %v1212_v61 = vpop.permute.xlu0 %1211 }
0x1000   :  { %v1215_v38 = vsel %vm259_vm7, %v1212_v61, %v1174_v59 }
0x1001   :  { %1219 = vrot.lane.b32.xlu0 %v1215_v38, %s1568_s13  ;;  %v604_v21 = vpop.permute.xlu1 %603  ;;  %s1543_s13 = scalar_lea.vmem %s1321_s12, 512 }
0x1002   :  { %v608_v43 = vsel %vm45_vm8, %v604_v21, 0.0  ;;  %p1544_p0 = scmp.ne.s32.totalorder %s1321_s12, %s1543_s13  ;;  %p1549_p2 = scmp.lt.s32.totalorder %s1543_s13, %s1543_s13 }
0x1003   :  { %v602_v13 = vpop.permute.xlu0 %601  ;;  %v632_v6 = vadd.f32 %v1894_v1, %v608_v43 }
0x1004   :  { %v607_v24 = vsel %vm45_vm8, %v602_v13, 0.0  ;;  %p1550_p3 = por %p1549_p2, %p1548_p1 }
0x1005   :  { %v631_v26 = vadd.f32 %v607_v24, %v1896_v10 }
0x1006   :  { %p1551_p4 = pnand %p1550_p3, %p1544_p0 }
0x100e   :  { %v643_v22 = vpop.permute.xlu1 %642 }
0x1010   :  { %v638_v23 = vpop.permute.xlu0 %637 }
0x1012   :  { %v655_v16 = vpop.permute.xlu1 %654 }
0x1013   :  { %v737_v3 = vadd.f32 %v1990_v53, %v655_v16  ;;  %v1307_v29 = vadd.f32 %v1461_v44, %v655_v16 }
0x1014   :  { %v650_v36 = vpop.permute.xlu0 %649 }
0x1015   :  { %v732_v47 = vadd.f32 %v1992_v54, %v650_v36  ;;  %v1302_v4 = vadd.f32 %v1301_v60, %v650_v36 }
0x1016   :  { %v626_v25 = vpop.permute.xlu1 %625 }
0x1017   :  { %v630_v57 = vsel %vm46_vm9, %v626_v25, 0.0 }
0x1018   :  { %v634_v27 = vadd.f32 %v632_v6, %v630_v57  ;;  %v624_v34 = vpop.permute.xlu0 %623 }
0x1019   :  { %v629_v39 = vsel %vm46_vm9, %v624_v34, 0.0 }
0x101a   :  { %v646_v40 = vadd.f32 %v643_v22, %v634_v27  ;;  %v633_v41 = vadd.f32 %v631_v26, %v629_v39 }
0x101c   :  { %v741_v50 = vadd.f32 %v737_v3, %v646_v40  ;;  %v645_v42 = vadd.f32 %v638_v23, %v633_v41 }
0x101e   :  { %743 = vst.msk [vmem:[#allocation2 + $0x8] sm:$0xff] %vm329_vm10, %v741_v50  ;;  %v740_v1 = vadd.f32 %v732_v47, %v645_v42 }
0x1020   :  { %742 = vst.msk [vmem:[#allocation2] sm:$0xff] %vm329_vm10, %v740_v1 }
0x1069   :  { %v1200_v52 = vpop.permute.xlu1 %1199 }
0x106a   :  { %v1204_v59 = vsel %vm45_vm8, %v1200_v52, 0.0 }
0x106b   :  { %v1198_v10 = vpop.permute.xlu0 %1197  ;;  %v1228_v45 = vadd.f32 %v1996_v49, %v1204_v59 }
0x106c   :  { %v1203_v53 = vsel %vm45_vm8, %v1198_v10, 0.0 }
0x106d   :  { %v1227_v51 = vadd.f32 %v1203_v53, %v1998_v32 }
0x1071   :  { %v1222_v48 = vpop.permute.xlu1 %1221 }
0x1072   :  { %v1226_v54 = vsel %vm46_vm9, %v1222_v48, 0.0 }
0x1073   :  { %v1230_v55 = vadd.f32 %v1228_v45, %v1226_v54  ;;  %v1220_v56 = vpop.permute.xlu0 %1219 }
0x1074   :  { %v1225_v62 = vsel %vm46_vm9, %v1220_v56, 0.0 }
0x1075   :  { %v1232_v63 = vadd.f32 %v1230_v55, %v643_v22  ;;  %v1229_v2 = vadd.f32 %v1227_v51, %v1225_v62 }
0x1077   :  { %v1311_v5 = vadd.f32 %v1307_v29, %v1232_v63  ;;  %v1231_v49 = vadd.f32 %v1229_v2, %v638_v23 }
0x1079   :  { %1314 = vst.msk [vmem:[#allocation2 + $0x18] sm:$0xff] %vm329_vm10, %v1311_v5  ;;  %v1310_v7 = vadd.f32 %v1302_v4, %v1231_v49 }
0x107b   :  { %1313 = vst.msk [vmem:[#allocation2 + $0x10] sm:$0xff] %vm329_vm10, %v1310_v7 }
0x107c   :  { %1554 = shalt.err (!%p1551_p4)
}
0x107d   :  { %s1570_s26 = smov 128   ;;  %s1571_s27 = smov 8  }
0x107e   :  { %1326 = dma.vmem_to_hbm [thread:$0]  %s1321_s12, 512, %s2087_s4, [#allocation3], %s1570_s26, %s1570_s26, %s1571_s27  }
0x107f   :  { %1563 = dma.done.wait [#allocation3], 512  }
0x1080   :  { %1564 = vsyncadd [#allocation3], 4294966784 }
0x1081   :  { %1330 = vsyncpa [#allocation3], 1 }

</bundles_post_ra>
